<compile_context>
chip_gen: v6e
topology: v6e:2x2x1
jax: 0.10.0
libtpu: 0.0.40
codegen_flags: <defaults>
</compile_context>

<pallas_src>
import functools
import math

import jax
import jax.numpy as jnp
from jax import lax
from jax.experimental import pallas as pl
from jax.experimental.pallas import tpu as pltpu

LANE = 128
NEG_INF = -1e30          # python float (a jnp scalar would be captured as a kernel const)


# ----------------------------------------------------------------------------
# helpers
# ----------------------------------------------------------------------------
def _ceil_to(n, m):
    return ((n + m - 1) // m) * m


def _pad2(a, rows, cols):
    r, c = a.shape
    if r == rows and c == cols:
        return a
    return jnp.pad(a, ((0, rows - r), (0, cols - c)))


@functools.lru_cache(maxsize=None)
def _vmem_capacity_bytes():
    """Physical VMEM per core (generation-aware), with a conservative fallback."""
    try:
        cap = getattr(pltpu.get_tpu_info(), "vmem_capacity_bytes", None)
        if cap:
            return int(cap)
    except Exception:
        pass
    return 64 * 1024 * 1024      # v7x-sized fallback


def _fused_vmem_limit():
    # ~96 MiB on v5e/v6e (128 MiB physical), ~48 MiB on v7x (64 MiB physical).
    return int(_vmem_capacity_bytes() * 0.75)


def _tiled_vmem_limit():
    return min(64 * 1024 * 1024, int(_vmem_capacity_bytes() * 0.75))


# ----------------------------------------------------------------------------
# parameters (matches snowball_layer.reset_parameters: U(-1/sqrt(out), 1/sqrt(out)))
# ----------------------------------------------------------------------------
def init_snowball_params(key, in_f, out_f):
    kw, kb = jax.random.split(key)
    stdv = 1.0 / math.sqrt(out_f)
    w = jax.random.uniform(kw, (in_f, out_f), jnp.float32, -stdv, stdv)
    b = jax.random.uniform(kb, (out_f,), jnp.float32, -stdv, stdv)
    return w, b


def init_linear_tanh_snowball(key, nfeat, nlayers, nhid, nclass):
    keys = jax.random.split(key, nlayers + 2)
    hidden = [init_snowball_params(keys[k], k * nhid + nfeat, nhid) for k in range(nlayers)]
    width = nlayers * nhid + nfeat
    classifier = init_snowball_params(keys[nlayers], width, width)
    out = init_snowball_params(keys[nlayers + 1], width, nclass)
    return hidden, classifier, out


# ----------------------------------------------------------------------------
# pure-JAX reference (high precision) — mirrors the PyTorch forward (eval mode)
# ----------------------------------------------------------------------------
def linear_tanh_snowball_reference(params, x, adj):
    hidden, (wc, bc), (wo, bo) = params
    hp = lax.Precision.HIGHEST
    blocks = []
    for k, (w, b) in enumerate(hidden):
        inp = x if k == 0 else jnp.concatenate([x] + blocks, axis=1)
        blocks.append(jnp.dot(adj, jnp.dot(inp, w, precision=hp), precision=hp) + b)
    cat = jnp.concatenate([x] + blocks, axis=1)
    c = jnp.tanh(jnp.dot(cat, wc, precision=hp) + bc)
    o = jnp.dot(adj, jnp.dot(c, wo, precision=hp), precision=hp) + bo
    return jax.nn.log_softmax(o, axis=1)


# ----------------------------------------------------------------------------
# lane-dense padded parameter layout (shared by fused and tiled paths)
# ----------------------------------------------------------------------------
def _padded_dims(nfeat, nlayers, nhid, nclass):
    FB = _ceil_to(nfeat, LANE)      # padded x block width
    HB = _ceil_to(nhid, LANE)       # padded hidden block width
    width = nfeat + nlayers * nhid
    CW = _ceil_to(width, LANE)      # padded classifier output width
    CP = _ceil_to(nclass, LANE)     # padded class count
    CATW = FB + nlayers * HB        # padded concat width (block layout)
    return dict(FB=FB, HB=HB, CW=CW, CP=CP, CATW=CATW, width=width)


def _prepare_padded_params(params, nfeat, nlayers, nhid, nclass, matmul_dtype):
    """Re-lay weights out for the 128-lane-padded block layout of the concat buffer."""
    hidden, (wc, bc), (wo, bo) = params
    d = _padded_dims(nfeat, nlayers, nhid, nclass)
    FB, HB, CW, CP, width = d["FB"], d["HB"], d["CW"], d["CP"], d["width"]

    def block_pad_rows(w, k, out_pad):
        # rows of w correspond to [x | h_0 | ... | h_{k-1}]; pad each row-block
        # independently so it lines up with the padded concat layout.
        out_f = w.shape[1]
        pieces = [jnp.pad(w[:nfeat], ((0, FB - nfeat), (0, out_pad - out_f)))]
        for j in range(k):
            rows = w[nfeat + j * nhid: nfeat + (j + 1) * nhid]
            pieces.append(jnp.pad(rows, ((0, HB - nhid), (0, out_pad - out_f))))
        return jnp.concatenate(pieces, axis=0)

    hp = []
    for k, (w, b) in enumerate(hidden):
        wp = block_pad_rows(w, k, HB).astype(matmul_dtype)
        bp = jnp.pad(b, (0, HB - nhid)).reshape(1, HB).astype(jnp.float32)
        hp.append((wp, bp))
    wcp = block_pad_rows(wc, nlayers, CW).astype(matmul_dtype)
    bcp = jnp.pad(bc, (0, CW - width)).reshape(1, CW).astype(jnp.float32)
    wop = jnp.pad(wo, ((0, CW - width), (0, CP - nclass))).astype(matmul_dtype)
    bop = jnp.pad(bo, (0, CP - nclass)).reshape(1, CP).astype(jnp.float32)
    return hp, (wcp, bcp), (wop, bop), d


# ----------------------------------------------------------------------------
# Path 1: fully fused single kernel (small graphs — everything fits in VMEM)
# ----------------------------------------------------------------------------
def _fused_snowball_kernel(*refs, nlayers, fb, hb, nclass, matmul_dtype):
    """Whole forward in one kernel: hidden layers -> tanh classifier -> out -> log_softmax."""
    x_ref, adj_ref = refs[0], refs[1]
    idx = 2
    w_refs, b_refs = [], []
    for _ in range(nlayers):
        w_refs.append(refs[idx]); b_refs.append(refs[idx + 1]); idx += 2
    wc_ref, bc_ref, wo_ref, bo_ref = refs[idx: idx + 4]
    o_ref, cat_ref = refs[idx + 4], refs[idx + 5]

    adj_m = adj_ref[...]                       # matmul dtype (bf16 on v6e/v7x)
    cat_ref[:, 0:fb] = x_ref[...]              # x block of the concat buffer

    for k in range(nlayers):
        inp = cat_ref[:, 0: fb + k * hb]       # concat([x, h_0..h_{k-1}]) (static slice)
        w = w_refs[k][...]
        # Cheaper association: (adj @ X) @ W when out_f > in_f, else adj @ (X @ W).
        if w.shape[1] > inp.shape[1]:
            h = jnp.dot(
                jnp.dot(adj_m, inp, preferred_element_type=jnp.float32).astype(matmul_dtype),
                w, preferred_element_type=jnp.float32)
        else:
            h = jnp.dot(
                adj_m,
                jnp.dot(inp, w, preferred_element_type=jnp.float32).astype(matmul_dtype),
                preferred_element_type=jnp.float32)
        h = h + b_refs[k][...]                 # f32 epilogue
        # TODO(synk): F.dropout(training=True) would need an RNG mask here; eval
        # semantics (identity) are used, matching training=False.
        cat_ref[:, fb + k * hb: fb + (k + 1) * hb] = h.astype(cat_ref.dtype)

    # Classifier (eye=1: no adjacency aggregation), tanh in f32.
    c = jnp.tanh(
        jnp.dot(cat_ref[...], wc_ref[...], preferred_element_type=jnp.float32)
        + bc_ref[...])

    # Output layer + fused log_softmax over the class axis (padded classes masked).
    cw = jnp.dot(c.astype(matmul_dtype), wo_ref[...], preferred_element_type=jnp.float32)
    logits = jnp.dot(adj_m, cw.astype(matmul_dtype),
                     preferred_element_type=jnp.float32) + bo_ref[...]
    col = lax.broadcasted_iota(jnp.int32, logits.shape, 1)
    logits = jnp.where(col < nclass, logits, NEG_INF)
    m = jnp.max(logits, axis=1, keepdims=True)
    s = logits - m
    o_ref[...] = (s - jnp.log(jnp.sum(jnp.exp(s), axis=1, keepdims=True))).astype(o_ref.dtype)


def linear_tanh_snowball_forward_fused(params, x, adj, *, matmul_dtype=jnp.bfloat16):
    N, nfeat = x.shape
    nlayers = len(params[0])
    nhid = params[0][0][0].shape[1]
    nclass = params[2][0].shape[1]
    hp, (wcp, bcp), (wop, bop), d = _prepare_padded_params(
        params, nfeat, nlayers, nhid, nclass, matmul_dtype)
    FB, HB, CP, CATW = d["FB"], d["HB"], d["CP"], d["CATW"]
    Np = _ceil_to(max(N, LANE), LANE)          # lane-dense adj (last dim multiple of 128)

    xp = _pad2(x, Np, FB).astype(matmul_dtype)
    adjp = _pad2(adj, Np, Np).astype(matmul_dtype)

    inputs = [xp, adjp]
    for w, b in hp:
        inputs += [w, b]
    inputs += [wcp, bcp, wop, bop]

    kernel = functools.partial(_fused_snowball_kernel, nlayers=nlayers, fb=FB, hb=HB,
                               nclass=nclass, matmul_dtype=matmul_dtype)
    vmem = pl.BlockSpec(memory_space=pltpu.MemorySpace.VMEM)
    out_p = pl.pallas_call(
        kernel,
        out_shape=jax.ShapeDtypeStruct((Np, CP), jnp.float32),
        in_specs=[vmem] * len(inputs),
        out_specs=vmem,
        scratch_shapes=[pltpu.VMEM((Np, CATW), matmul_dtype)],
        compiler_params=pltpu.CompilerParams(vmem_limit_bytes=_fused_vmem_limit()),
    )(*inputs)
    return out_p[:N, :nclass]


# ----------------------------------------------------------------------------
# Path 2: tiled kernels (large graphs — adj streamed / pipelined over tiles)
# ----------------------------------------------------------------------------
def _mm_bias_act_kernel(a_ref, b_ref, bias_ref, o_ref, acc_ref, *, act, n_valid_cols):
    k = pl.program_id(2)

    @pl.when(k == 0)
    def _():
        acc_ref[...] = jnp.zeros_like(acc_ref)

    acc_ref[...] += jnp.dot(a_ref[...], b_ref[...], preferred_element_type=jnp.float32)

    @pl.when(k == pl.num_programs(2) - 1)
    def _():
        out = acc_ref[...] + bias_ref[...]      # f32 epilogue
        if act == "tanh":
            out = jnp.tanh(out)
        elif act == "log_softmax":
            col = lax.broadcasted_iota(jnp.int32, out.shape, 1)
            out = jnp.where(col < n_valid_cols, out, NEG_INF)
            m = jnp.max(out, axis=1, keepdims=True)
            s = out - m
            out = s - jnp.log(jnp.sum(jnp.exp(s), axis=1, keepdims=True))
        o_ref[...] = out.astype(o_ref.dtype)    # cast folded into the epilogue


def _pick_tile(dim, cap, *, min_blocks=1):
    """Largest multiple of LANE that divides `dim`, <= cap, and (when dim is big
    enough) yields at least `min_blocks` blocks.  `dim` must be LANE-aligned."""
    assert dim % LANE == 0, dim
    if min_blocks > 1 and dim >= min_blocks * LANE:
        cap = min(cap, dim // min_blocks)
    cap = min(cap, dim)
    t = (cap // LANE) * LANE
    while t > LANE and dim % t:
        t -= LANE
    return t


def matmul_bias_act(a, b, bias2d=None, *, act=None, n_valid_cols=None,
                    out_dtype=jnp.float32, tm_cap=512, tn_cap=512, tk_cap=1024):
    """out = act(a @ b + bias); tiled over (M, N, K) with an f32 VMEM accumulator."""
    M, K = a.shape
    K2, N = b.shape
    assert K == K2
    if bias2d is None:
        bias2d = jnp.zeros((1, N), jnp.float32)
    # >=2 blocks on the parallel M axis so both v7x TensorCores get work.
    tm = _pick_tile(M, tm_cap, min_blocks=2)
    tn = _pick_tile(N, tn_cap)
    tk = _pick_tile(K, tk_cap)
    if act == "log_softmax":
        tn = N          # row reduction must see all (padded) classes in one block
    assert M % tm == 0 and N % tn == 0 and K % tk == 0
    kernel = functools.partial(
        _mm_bias_act_kernel, act=act,
        n_valid_cols=N if n_valid_cols is None else n_valid_cols)
    return pl.pallas_call(
        kernel,
        out_shape=jax.ShapeDtypeStruct((M, N), out_dtype),
        grid_spec=pltpu.PrefetchScalarGridSpec(
            num_scalar_prefetch=0,
            grid=(M // tm, N // tn, K // tk),
            in_specs=[pl.BlockSpec((tm, tk), lambda i, j, k: (i, k)),
                      pl.BlockSpec((tk, tn), lambda i, j, k: (k, j)),
                      pl.BlockSpec((1, tn), lambda i, j, k: (0, j))],
            out_specs=pl.BlockSpec((tm, tn), lambda i, j, k: (i, j)),
            scratch_shapes=[pltpu.VMEM((tm, tn), jnp.float32)]),
        compiler_params=pltpu.CompilerParams(
            dimension_semantics=("parallel", "parallel", "arbitrary"),
            vmem_limit_bytes=_tiled_vmem_limit()),
    )(a, b, bias2d)


def snowball_layer_tiled(x, w, bias2d, adj=None, *, act=None, n_valid_cols=None,
                         matmul_dtype=jnp.bfloat16, out_dtype=jnp.float32):
    """One snowball layer on padded operands. adj=None <=> eye=1 (no aggregation)."""
    md = matmul_dtype
    x = x.astype(md)
    w = w.astype(md)
    if adj is None:
        return matmul_bias_act(x, w, bias2d, act=act, n_valid_cols=n_valid_cols,
                               out_dtype=out_dtype)
    adj = adj.astype(md)
    if w.shape[1] > x.shape[1]:       # (adj @ X) @ W is cheaper when out_f > in_f
        ax = matmul_bias_act(adj, x, out_dtype=md)           # intermediate stays in md
        return matmul_bias_act(ax, w, bias2d, act=act, n_valid_cols=n_valid_cols,
                               out_dtype=out_dtype)
    xw = matmul_bias_act(x, w, out_dtype=md)                  # intermediate stays in md
    return matmul_bias_act(adj, xw, bias2d, act=act, n_valid_cols=n_valid_cols,
                           out_dtype=out_dtype)


def linear_tanh_snowball_forward_tiled(params, x, adj, *, matmul_dtype=jnp.bfloat16):
    N, nfeat = x.shape
    nlayers = len(params[0])
    nhid = params[0][0][0].shape[1]
    nclass = params[2][0].shape[1]
    hp, (wcp, bcp), (wop, bop), d = _prepare_padded_params(
        params, nfeat, nlayers, nhid, nclass, matmul_dtype)
    FB, HB, CATW = d["FB"], d["HB"], d["CATW"]
    Np = _ceil_to(max(N, 256), 256)   # node axis tiled (multiple of LANE)

    xp = _pad2(x, Np, FB).astype(matmul_dtype)
    adjp = _pad2(adj, Np, Np).astype(matmul_dtype)

    # Preallocated concat buffer: each h_k lands in its 128-aligned column block,
    # layers read only the growing column prefix (no repeated full concatenation).
    cat = jnp.zeros((Np, CATW), matmul_dtype)
    cat = lax.dynamic_update_slice(cat, xp, (0, 0))
    for k, (w, b) in enumerate(hp):
        inp = xp if k == 0 else lax.slice(cat, (0, 0), (Np, FB + k * HB))
        h = snowball_layer_tiled(inp, w, b, adjp, act=None,
                                 matmul_dtype=matmul_dtype, out_dtype=matmul_dtype)
        # TODO(synk): dropout (training=True) omitted — eval semantics (identity).
        cat = lax.dynamic_update_slice(cat, h, (0, FB + k * HB))
    c = snowball_layer_tiled(cat, wcp, bcp, None, act="tanh",
                             matmul_dtype=matmul_dtype, out_dtype=matmul_dtype)
    out_p = snowball_layer_tiled(c, wop, bop, adjp,
                                 act="log_softmax", n_valid_cols=nclass,
                                 matmul_dtype=matmul_dtype, out_dtype=jnp.float32)
    return out_p[:N, :nclass]


# ----------------------------------------------------------------------------
# size-gated dispatch (generation-aware)
# ----------------------------------------------------------------------------
def _fused_vmem_estimate(N, nfeat, nlayers, nhid, nclass, matmul_dtype):
    d = _padded_dims(nfeat, nlayers, nhid, nclass)
    FB, HB, CW, CP, CATW = d["FB"], d["HB"], d["CW"], d["CP"], d["CATW"]
    Np = _ceil_to(max(N, LANE), LANE)
    isz = jnp.dtype(matmul_dtype).itemsize
    w_elems = sum((FB + k * HB) * HB for k in range(nlayers)) + CATW * CW + CW * CP
    n = (Np * Np + Np * FB + Np * CATW + w_elems) * isz        # adj, x, cat scratch, weights
    n += (Np * CP + Np * CW + Np * max(HB, CP)) * 4            # output + f32 temporaries
    n += (nlayers * HB + CW + CP) * 4                          # biases
    return n


def linear_tanh_snowball_forward(params, x, adj, *, matmul_dtype=jnp.bfloat16):
    """Dispatch: fully-fused single kernel when it fits VMEM, else tiled kernels."""
    N, nfeat = x.shape
    nlayers = len(params[0])
    nhid = params[0][0][0].shape[1]
    nclass = params[2][0].shape[1]
    est = _fused_vmem_estimate(N, nfeat, nlayers, nhid, nclass, matmul_dtype)
    if est <= int(_vmem_capacity_bytes() * 0.6):
        return linear_tanh_snowball_forward_fused(params, x, adj, matmul_dtype=matmul_dtype)
    return linear_tanh_snowball_forward_tiled(params, x, adj, matmul_dtype=matmul_dtype)


# ----------------------------------------------------------------------------
# demo / self-check
# ----------------------------------------------------------------------------
if __name__ == "__main__":
    # ---- Small graph: fully-fused single-kernel path ------------------------
    N, NFEAT, NLAYERS, NHID, NCLASS = 8, 16, 2, 32, 8
    key = jax.random.PRNGKey(0)
    k_x, k_adj, k_p = jax.random.split(key, 3)

    x = jax.random.normal(k_x, (N, NFEAT), jnp.float32)
    a = (jax.random.uniform(k_adj, (N, N)) > 0.6).astype(jnp.float32)
    a = jnp.maximum(a, a.T) + jnp.eye(N, dtype=jnp.float32)
    adj = a / jnp.sum(a, axis=1, keepdims=True)      # row-normalized dense adjacency
    params = init_linear_tanh_snowball(k_p, NFEAT, NLAYERS, NHID, NCLASS)

    ref = linear_tanh_snowball_reference(params, x, adj)

    # f32 MXU operands: near-exact against the reference.
    out_f32 = jax.block_until_ready(
        linear_tanh_snowball_forward(params, x, adj, matmul_dtype=jnp.float32))
    assert out_f32.shape == (N, NCLASS)
    assert jnp.allclose(jnp.sum(jnp.exp(out_f32), axis=1), 1.0, atol=1e-3)
    assert jnp.allclose(out_f32, ref, atol=5e-2, rtol=5e-2)

    # bf16 MXU operands (recommended on v6e/v7x), f32 epilogues (v5e-safe).
    out_bf16 = jax.block_until_ready(
        linear_tanh_snowball_forward(params, x, adj, matmul_dtype=jnp.bfloat16))
    assert out_bf16.shape == (N, NCLASS)
    assert jnp.allclose(jnp.sum(jnp.exp(out_bf16), axis=1), 1.0, atol=1e-3)
    assert jnp.allclose(out_bf16, ref, atol=0.3, rtol=0.3)

    # ---- Larger graph: tiled / pipelined path --------------------------------
    N2, NFEAT2, NLAYERS2, NHID2, NCLASS2 = 300, 100, 2, 64, 10
    k_x2, k_adj2, k_p2 = jax.random.split(jax.random.PRNGKey(1), 3)
    x2 = jax.random.normal(k_x2, (N2, NFEAT2), jnp.float32)
    a2 = (jax.random.uniform(k_adj2, (N2, N2)) > 0.97).astype(jnp.float32)
    a2 = jnp.maximum(a2, a2.T) + jnp.eye(N2, dtype=jnp.float32)
    adj2 = a2 / jnp.sum(a2, axis=1, keepdims=True)
    params2 = init_linear_tanh_snowball(k_p2, NFEAT2, NLAYERS2, NHID2, NCLASS2)

    ref2 = linear_tanh_snowball_reference(params2, x2, adj2)
    out2 = jax.block_until_ready(
        linear_tanh_snowball_forward_tiled(params2, x2, adj2, matmul_dtype=jnp.float32))
    assert out2.shape == (N2, NCLASS2)
    assert jnp.allclose(jnp.sum(jnp.exp(out2), axis=1), 1.0, atol=1e-3)
    assert jnp.allclose(out2, ref2, atol=5e-2, rtol=5e-2)

    print("KERNEL_OK")
</pallas_src>

<mosaic_0001>
module attributes {stable_mosaic.version = 11 : i64} {
  func.func @_fused_snowball_kernel(%arg0: memref<128x128xf32, #tpu.memory_space<vmem>>, %arg1: memref<128x128xf32, #tpu.memory_space<vmem>>, %arg2: memref<128x128xf32, #tpu.memory_space<vmem>>, %arg3: memref<1x128xf32, #tpu.memory_space<vmem>>, %arg4: memref<256x128xf32, #tpu.memory_space<vmem>>, %arg5: memref<1x128xf32, #tpu.memory_space<vmem>>, %arg6: memref<384x128xf32, #tpu.memory_space<vmem>>, %arg7: memref<1x128xf32, #tpu.memory_space<vmem>>, %arg8: memref<128x128xf32, #tpu.memory_space<vmem>>, %arg9: memref<1x128xf32, #tpu.memory_space<vmem>>, %arg10: memref<128x128xf32, #tpu.memory_space<vmem>>, %arg11: memref<128x384xf32, #tpu.memory_space<vmem>>) attributes {dimension_semantics = [], scalar_prefetch = 0 : i64, scratch_operands = 1 : i64, tpu.core_type = #tpu.core_type<tc>} {
    %c0 = arith.constant 0 : index
    %c0_0 = arith.constant 0 : index
    %0 = vector.load %arg1[%c0, %c0_0] : memref<128x128xf32, #tpu.memory_space<vmem>>, vector<128x128xf32>
    %c0_1 = arith.constant 0 : index
    %c0_2 = arith.constant 0 : index
    %1 = vector.load %arg0[%c0_1, %c0_2] : memref<128x128xf32, #tpu.memory_space<vmem>>, vector<128x128xf32>
    %c0_3 = arith.constant 0 : index
    %c0_4 = arith.constant 0 : index
    %2 = vector.load %arg11[%c0_3, %c0_4] : memref<128x384xf32, #tpu.memory_space<vmem>>, vector<128x128xf32>
    tpu.vector_store %arg11[%c0_3, %c0_4], %1 {strides = array<i32>} : memref<128x384xf32, #tpu.memory_space<vmem>>, vector<128x128xf32>,
    %c0_5 = arith.constant 0 : index
    %c0_6 = arith.constant 0 : index
    %3 = vector.load %arg11[%c0_5, %c0_6] : memref<128x384xf32, #tpu.memory_space<vmem>>, vector<128x128xf32>
    %c0_7 = arith.constant 0 : index
    %c0_8 = arith.constant 0 : index
    %4 = vector.load %arg2[%c0_7, %c0_8] : memref<128x128xf32, #tpu.memory_space<vmem>>, vector<128x128xf32>
    %cst = arith.constant dense<0.000000e+00> : vector<128x128xf32>
    %5 = tpu.matmul %3, %4, %cst {dimension_numbers = #tpu.dot_dimension_numbers<[1], [0], [0], [1], [0, 0, 1, 1], [], []>} : vector<128x128xf32>, vector<128x128xf32>, vector<128x128xf32> -> vector<128x128xf32>
    %cst_9 = arith.constant dense<0.000000e+00> : vector<128x128xf32>
    %6 = tpu.matmul %0, %5, %cst_9 {dimension_numbers = #tpu.dot_dimension_numbers<[1], [0], [0], [1], [0, 0, 1, 1], [], []>} : vector<128x128xf32>, vector<128x128xf32>, vector<128x128xf32> -> vector<128x128xf32>
    %c0_10 = arith.constant 0 : index
    %c0_11 = arith.constant 0 : index
    %7 = vector.load %arg3[%c0_10, %c0_11] : memref<1x128xf32, #tpu.memory_space<vmem>>, vector<1x128xf32>
    %8 = vector.broadcast %7 : vector<1x128xf32> to vector<128x128xf32>
    %9 = arith.addf %6, %8 : vector<128x128xf32>
    %c0_12 = arith.constant 0 : index
    %c128 = arith.constant 128 : index
    %10 = vector.load %arg11[%c0_12, %c128] : memref<128x384xf32, #tpu.memory_space<vmem>>, vector<128x128xf32>
    tpu.vector_store %arg11[%c0_12, %c128], %9 {strides = array<i32>} : memref<128x384xf32, #tpu.memory_space<vmem>>, vector<128x128xf32>,
    %c0_13 = arith.constant 0 : index
    %c0_14 = arith.constant 0 : index
    %11 = vector.load %arg11[%c0_13, %c0_14] : memref<128x384xf32, #tpu.memory_space<vmem>>, vector<128x256xf32>
    %c0_15 = arith.constant 0 : index
    %c0_16 = arith.constant 0 : index
    %12 = vector.load %arg4[%c0_15, %c0_16] : memref<256x128xf32, #tpu.memory_space<vmem>>, vector<256x128xf32>
    %cst_17 = arith.constant dense<0.000000e+00> : vector<128x128xf32>
    %13 = tpu.matmul %11, %12, %cst_17 {dimension_numbers = #tpu.dot_dimension_numbers<[1], [0], [0], [1], [0, 0, 1, 1], [], []>} : vector<128x256xf32>, vector<256x128xf32>, vector<128x128xf32> -> vector<128x128xf32>
    %cst_18 = arith.constant dense<0.000000e+00> : vector<128x128xf32>
    %14 = tpu.matmul %0, %13, %cst_18 {dimension_numbers = #tpu.dot_dimension_numbers<[1], [0], [0], [1], [0, 0, 1, 1], [], []>} : vector<128x128xf32>, vector<128x128xf32>, vector<128x128xf32> -> vector<128x128xf32>
    %c0_19 = arith.constant 0 : index
    %c0_20 = arith.constant 0 : index
    %15 = vector.load %arg5[%c0_19, %c0_20] : memref<1x128xf32, #tpu.memory_space<vmem>>, vector<1x128xf32>
    %16 = vector.broadcast %15 : vector<1x128xf32> to vector<128x128xf32>
    %17 = arith.addf %14, %16 : vector<128x128xf32>
    %c0_21 = arith.constant 0 : index
    %c256 = arith.constant 256 : index
    %18 = vector.load %arg11[%c0_21, %c256] : memref<128x384xf32, #tpu.memory_space<vmem>>, vector<128x128xf32>
    tpu.vector_store %arg11[%c0_21, %c256], %17 {strides = array<i32>} : memref<128x384xf32, #tpu.memory_space<vmem>>, vector<128x128xf32>,
    %c0_22 = arith.constant 0 : index
    %c0_23 = arith.constant 0 : index
    %19 = vector.load %arg11[%c0_22, %c0_23] : memref<128x384xf32, #tpu.memory_space<vmem>>, vector<128x384xf32>
    %c0_24 = arith.constant 0 : index
    %c0_25 = arith.constant 0 : index
    %20 = vector.load %arg6[%c0_24, %c0_25] : memref<384x128xf32, #tpu.memory_space<vmem>>, vector<384x128xf32>
    %cst_26 = arith.constant dense<0.000000e+00> : vector<128x128xf32>
    %21 = tpu.matmul %19, %20, %cst_26 {dimension_numbers = #tpu.dot_dimension_numbers<[1], [0], [0], [1], [0, 0, 1, 1], [], []>} : vector<128x384xf32>, vector<384x128xf32>, vector<128x128xf32> -> vector<128x128xf32>
    %c0_27 = arith.constant 0 : index
    %c0_28 = arith.constant 0 : index
    %22 = vector.load %arg7[%c0_27, %c0_28] : memref<1x128xf32, #tpu.memory_space<vmem>>, vector<1x128xf32>
    %23 = vector.broadcast %22 : vector<1x128xf32> to vector<128x128xf32>
    %24 = arith.addf %21, %23 : vector<128x128xf32>
    %25 = math.tanh %24 : vector<128x128xf32>
    %c0_29 = arith.constant 0 : index
    %c0_30 = arith.constant 0 : index
    %26 = vector.load %arg8[%c0_29, %c0_30] : memref<128x128xf32, #tpu.memory_space<vmem>>, vector<128x128xf32>
    %cst_31 = arith.constant dense<0.000000e+00> : vector<128x128xf32>
    %27 = tpu.matmul %25, %26, %cst_31 {dimension_numbers = #tpu.dot_dimension_numbers<[1], [0], [0], [1], [0, 0, 1, 1], [], []>} : vector<128x128xf32>, vector<128x128xf32>, vector<128x128xf32> -> vector<128x128xf32>
    %cst_32 = arith.constant dense<0.000000e+00> : vector<128x128xf32>
    %28 = tpu.matmul %0, %27, %cst_32 {dimension_numbers = #tpu.dot_dimension_numbers<[1], [0], [0], [1], [0, 0, 1, 1], [], []>} : vector<128x128xf32>, vector<128x128xf32>, vector<128x128xf32> -> vector<128x128xf32>
    %c0_33 = arith.constant 0 : index
    %c0_34 = arith.constant 0 : index
    %29 = vector.load %arg9[%c0_33, %c0_34] : memref<1x128xf32, #tpu.memory_space<vmem>>, vector<1x128xf32>
    %30 = vector.broadcast %29 : vector<1x128xf32> to vector<128x128xf32>
    %31 = arith.addf %28, %30 : vector<128x128xf32>
    %32 = tpu.iota {dimensions = array<i32: 1>} : vector<128x128xi32>
    %c8_i32 = arith.constant 8 : i32
    %33 = vector.broadcast %c8_i32 : i32 to vector<128x128xi32>
    %34 = arith.cmpi slt, %32, %33 : vector<128x128xi32>
    %cst_35 = arith.constant -1.000000e+30 : f32
    %35 = vector.broadcast %cst_35 : f32 to vector<128x128xf32>
    %36 = arith.select %34, %31, %35 : vector<128x128xi1>, vector<128x128xf32>
    %cst_36 = arith.constant dense<0xFF800000> : vector<128xf32>
    %37 = vector.multi_reduction <maximumf>, %36, %cst_36 [1] : vector<128x128xf32> to vector<128xf32>
    %38 = vector.shape_cast %37 : vector<128xf32> to vector<128x1xf32>
    %39 = vector.broadcast %38 : vector<128x1xf32> to vector<128x128xf32>
    %40 = arith.subf %36, %39 : vector<128x128xf32>
    %41 = math.exp %40 : vector<128x128xf32>
    %cst_37 = arith.constant dense<0.000000e+00> : vector<128xf32>
    %42 = vector.multi_reduction <add>, %41, %cst_37 [1] : vector<128x128xf32> to vector<128xf32>
    %43 = vector.shape_cast %42 : vector<128xf32> to vector<128x1xf32>
    %44 = math.log %43 : vector<128x1xf32>
    %45 = vector.broadcast %44 : vector<128x1xf32> to vector<128x128xf32>
    %46 = arith.subf %40, %45 : vector<128x128xf32>
    %c0_38 = arith.constant 0 : index
    %c0_39 = arith.constant 0 : index
    %47 = vector.load %arg10[%c0_38, %c0_39] : memref<128x128xf32, #tpu.memory_space<vmem>>, vector<128x128xf32>
    tpu.vector_store %arg10[%c0_38, %c0_39], %46 {strides = array<i32>} : memref<128x128xf32, #tpu.memory_space<vmem>>, vector<128x128xf32>,
    return
  }
}

</mosaic_0001>

<bundles_post_ra>
// kernel: tpu_custom_call.1
= control target key start
LH: loop header
LB: loop body
LE: loop exit
PB: predicated region body
PF: predicated region fallthrough
CT: control target
= control target key end

     0   :  { %15 = vsyncpa [#allocation4], 0  ;;  %s3297_s0 = inlined_call_operand.hbm [shape: f32[128,128], index: 0, kind: input, shape index: {}]   ;;  %s3298_s1 = inlined_call_operand.hbm [shape: f32[128,128], index: 1, kind: input, shape index: {}]   ;;  %s3299_s2 = inlined_call_operand.hbm [shape: f32[128,128], index: 2, kind: input, shape index: {}]   ;;  %s3300_s3 = inlined_call_operand.vmem [shape: f32[1,128], index: 3, kind: input, shape index: {}]   ;;  %s3301_s4 = inlined_call_operand.hbm [shape: f32[256,128], index: 4, kind: input, shape index: {}]   ;;  %s3302_s5 = inlined_call_operand.vmem [shape: f32[1,128], index: 5, kind: input, shape index: {}]   ;;  %s3303_s6 = inlined_call_operand.hbm [shape: f32[384,128], index: 6, kind: input, shape index: {}]   ;;  %s3304_s7 = inlined_call_operand.vmem [shape: f32[1,128], index: 7, kind: input, shape index: {}]   ;;  %s3305_s8 = inlined_call_operand.hbm [shape: f32[128,128], index: 8, kind: input, shape index: {}]   ;;  %s3306_s9 = inlined_call_operand.vmem [shape: f32[1,128], index: 9, kind: input, shape index: {}]   ;;  %s3307_s10 = inlined_call_operand.hbm [shape: f32[128,128], index: 10, kind: output, shape index: {}]  }
   0x1   :  { %16 = vsyncpa [#allocation7], 0 }
   0x2   :  { %17 = vsyncpa [#allocation10], 0 }
   0x3   :  { %18 = vsyncpa [#allocation13], 0 }
   0x4   :  { %19 = vsyncpa [#allocation5], 0  ;;  %s2787_s13 = smov [#allocation6]   ;;  %s2788_s15 = smov [#allocation9]  }
   0x5   :  { %s37_s14 = sshll.u32 %s2787_s13, 4  ;;  %s63_s16 = sshll.u32 %s2788_s15, 4  ;;  %s38_s14 = int_to_ptr.vmem [resolvable:$true] %s37_s14  ;;  %s64_s16 = int_to_ptr.vmem [resolvable:$true] %s63_s16 }
   0x6   :  { %s2645_s17 = scalar_lea.vmem %s38_s14, 2048  ;;  %p2650_p1 = scmp.lt.s32.totalorder %s38_s14, %s38_s14 }
   0x7   :  { %p2646_p0 = scmp.ne.s32.totalorder %s38_s14, %s2645_s17  ;;  %p2651_p2 = scmp.lt.s32.totalorder %s2645_s17, %s2645_s17 }
   0x9   :  { %p2652_p3 = por %p2651_p2, %p2650_p1 }
   0xb   :  { %p2653_p4 = pnand %p2652_p3, %p2646_p0 }
   0xd   :  { %2656 = shalt.err (!%p2653_p4)
}
   0xe   :  { %s2789_s18 = smov 128   ;;  %s2790_s19 = smov 8  }
   0xf   :  { %43 = dma.hbm_to_vmem [thread:$0]  %s3298_s1, 2048, %s38_s14, [#allocation7], %s2789_s18, %s2789_s18, %s2790_s19  }
  0x10   :  { %s2665_s22 = scalar_lea.vmem %s64_s16, 4096  ;;  %p2670_p6 = scmp.lt.s32.totalorder %s64_s16, %s64_s16 }
  0x11   :  { %p2666_p5 = scmp.ne.s32.totalorder %s64_s16, %s2665_s22  ;;  %p2671_p7 = scmp.lt.s32.totalorder %s2665_s22, %s2665_s22 }
  0x13   :  { %p2672_p8 = por %p2671_p7, %p2670_p6 }
  0x15   :  { %p2673_p9 = pnand %p2672_p8, %p2666_p5 }
  0x17   :  { %2676 = shalt.err (!%p2673_p9)
}
  0x18   :  { %69 = dma.hbm_to_vmem [thread:$0]  %s3301_s4, 4096, %s64_s16, [#allocation10], %s2789_s18, %s2789_s18, %s2790_s19  }
  0x19   :  { %s2791_s25 = smov [#allocation3]   ;;  %s2792_s27 = smov [#allocation8]  }
  0x1a   :  { %s25_s26 = sshll.u32 %s2791_s25, 4  ;;  %s49_s28 = sshll.u32 %s2792_s27, 4  ;;  %s26_s26 = int_to_ptr.vmem [resolvable:$true] %s25_s26  ;;  %s50_s28 = int_to_ptr.vmem [resolvable:$true] %s49_s28 }
  0x1b   :  { %s2685_s1 = scalar_lea.vmem %s26_s26, 2048  ;;  %p2690_p11 = scmp.lt.s32.totalorder %s26_s26, %s26_s26 }
  0x1c   :  { %p2686_p10 = scmp.ne.s32.totalorder %s26_s26, %s2685_s1  ;;  %p2691_p12 = scmp.lt.s32.totalorder %s2685_s1, %s2685_s1 }
  0x1e   :  { %p2692_p13 = por %p2691_p12, %p2690_p11 }
  0x20   :  { %p2693_p0 = pnand %p2692_p13, %p2686_p10 }
  0x22   :  { %2696 = shalt.err (!%p2693_p0)
}
  0x23   :  { %31 = dma.hbm_to_vmem [thread:$0]  %s3297_s0, 2048, %s26_s26, [#allocation4], %s2789_s18, %s2789_s18, %s2790_s19  }
  0x24   :  { %s2705_s4 = scalar_lea.vmem %s50_s28, 2048  ;;  %p2710_p2 = scmp.lt.s32.totalorder %s50_s28, %s50_s28 }
  0x25   :  { %p2706_p1 = scmp.ne.s32.totalorder %s50_s28, %s2705_s4  ;;  %p2711_p3 = scmp.lt.s32.totalorder %s2705_s4, %s2705_s4 }
  0x27   :  { %p2712_p4 = por %p2711_p3, %p2710_p2 }
  0x29   :  { %p2713_p5 = pnand %p2712_p4, %p2706_p1 }
  0x2b   :  { %2716 = shalt.err (!%p2713_p5)
}
  0x2c   :  { %55 = dma.hbm_to_vmem [thread:$0]  %s3299_s2, 2048, %s50_s28, [#allocation7], %s2789_s18, %s2789_s18, %s2790_s19  }
  0x2d   :  { %s2793_s13 = smov [#allocation11]   ;;  %s2794_s15 = smov [#allocation12]  }
  0x2e   :  { %s77_s14 = sshll.u32 %s2793_s13, 4  ;;  %s91_s16 = sshll.u32 %s2794_s15, 4  ;;  %s78_s14 = int_to_ptr.vmem [resolvable:$true] %s77_s14  ;;  %s92_s16 = int_to_ptr.vmem [resolvable:$true] %s91_s16 }
  0x2f   :  { %s2725_s0 = scalar_lea.vmem %s78_s14, 6144  ;;  %p2730_p7 = scmp.lt.s32.totalorder %s78_s14, %s78_s14 }
  0x30   :  { %p2726_p6 = scmp.ne.s32.totalorder %s78_s14, %s2725_s0  ;;  %p2731_p8 = scmp.lt.s32.totalorder %s2725_s0, %s2725_s0 }
  0x32   :  { %p2732_p9 = por %p2731_p8, %p2730_p7 }
  0x34   :  { %p2733_p10 = pnand %p2732_p9, %p2726_p6 }
  0x36   :  { %2736 = shalt.err (!%p2733_p10)
}
  0x37   :  { %83 = dma.hbm_to_vmem [thread:$0]  %s3303_s6, 6144, %s78_s14, [#allocation10], %s2789_s18, %s2789_s18, %s2790_s19  }
  0x38   :  { %s2745_s2 = scalar_lea.vmem %s92_s16, 2048  ;;  %p2750_p12 = scmp.lt.s32.totalorder %s92_s16, %s92_s16 }
  0x39   :  { %p2746_p11 = scmp.ne.s32.totalorder %s92_s16, %s2745_s2  ;;  %p2751_p13 = scmp.lt.s32.totalorder %s2745_s2, %s2745_s2 }
  0x3b   :  { %p2752_p0 = por %p2751_p13, %p2750_p12 }
  0x3d   :  { %p2753_p1 = pnand %p2752_p0, %p2746_p11 }
  0x3f   :  { %2756 = shalt.err (!%p2753_p1)
}
  0x40   :  { %97 = dma.hbm_to_vmem [thread:$0]  %s3305_s8, 2048, %s92_s16, [#allocation13], %s2789_s18, %s2789_s18, %s2790_s19  }
  0x41   :  { %2777 = dma.done.wait [#allocation4], 2048  }
  0x42   :  { %2778 = vsyncadd [#allocation4], 4294965248 }
  0x43   :  { %2779 = dma.done.wait [#allocation7], 4096  }
  0x44   :  { %2780 = vsyncadd [#allocation7], 4294963200 }
  0x45   :  { %2781 = dma.done.wait [#allocation10], 10240  }
  0x46   :  { %2782 = vsyncadd [#allocation10], 4294957056 }
  0x47   :  { %2783 = dma.done.wait [#allocation13], 2048  }
  0x48   :  { %2784 = vsyncadd [#allocation13], 4294965248  ;;  %v197_v0 = vld [vmem:[#allocation8 + $0x78] sm:$0xff]  ;;  %v196_v1 = vld [vmem:[#allocation8 + $0x70] sm:$0xff] }
  0x49   :  { %2181 = vmatprep.subr.mxu0 %v197_v0  ;;  %v195_v2 = vld [vmem:[#allocation8 + $0x68] sm:$0xff]  ;;  %v194_v3 = vld [vmem:[#allocation8 + $0x60] sm:$0xff]  ;;  %v193_v5 = vld [vmem:[#allocation8 + $0x58] sm:$0xff] }
  0x4a   :  { %2182 = vmatpush3.msra.mxu0 %v197_v0  ;;  %v2887_v4 = vld [vmem:[#allocation3] sm:$0xff]  ;;  %v192_v6 = vld [vmem:[#allocation8 + $0x50] sm:$0xff]  ;;  %v191_v7 = vld [vmem:[#allocation8 + $0x48] sm:$0xff] }
  0x4b   :  { %2183 = vmatprep.subr.mxu0 %v196_v1  ;;  %2213 = vmatprep.mubr.f32.mxu0 %v2887_v4  ;;  %v190_v8 = vld [vmem:[#allocation8 + $0x40] sm:$0xff]  ;;  %v189_v9 = vld [vmem:[#allocation8 + $0x38] sm:$0xff]  ;;  %v188_v10 = vld [vmem:[#allocation8 + $0x30] sm:$0xff] }
  0x4c   :  { %2184 = vmatpush3.msra.mxu0 %v196_v1  ;;  %v187_v11 = vld [vmem:[#allocation8 + $0x28] sm:$0xff]  ;;  %v186_v12 = vld [vmem:[#allocation8 + $0x20] sm:$0xff]  ;;  %v185_v13 = vld [vmem:[#allocation8 + $0x18] sm:$0xff] }
  0x4d   :  { %2185 = vmatprep.subr.mxu0 %v195_v2  ;;  %v184_v14 = vld [vmem:[#allocation8 + $0x10] sm:$0xff]  ;;  %v183_v15 = vld [vmem:[#allocation8 + $0x8] sm:$0xff]  ;;  %v182_v16 = vld [vmem:[#allocation8] sm:$0xff] }
  0x4e   :  { %2186 = vmatpush3.msra.mxu0 %v195_v2  ;;  %v2890_v17 = vld [vmem:[#allocation3 + $0x8] sm:$0xff]  ;;  %v2892_v18 = vld [vmem:[#allocation3 + $0x10] sm:$0xff]  ;;  %v2896_v19 = vld [vmem:[#allocation3 + $0x18] sm:$0xff] }
  0x4f   :  { %2187 = vmatprep.subr.mxu0 %v194_v3  ;;  %v2898_v20 = vld [vmem:[#allocation3 + $0x20] sm:$0xff]  ;;  %v2902_v21 = vld [vmem:[#allocation3 + $0x28] sm:$0xff]  ;;  %v2904_v22 = vld [vmem:[#allocation3 + $0x30] sm:$0xff] }
  0x50   :  { %2188 = vmatpush3.msra.mxu0 %v194_v3  ;;  %3329 = vst [vmem:[#allocation20_spill] sm:$0xff] %v2904_v22  ;;  %v2908_v23 = vld [vmem:[#allocation3 + $0x38] sm:$0xff]  ;;  %v2910_v24 = vld [vmem:[#allocation3 + $0x40] sm:$0xff]  ;;  %v2914_v25 = vld [vmem:[#allocation3 + $0x48] sm:$0xff] }
  0x51   :  { %2189 = vmatprep.subr.mxu0 %v193_v5  ;;  %3330 = vst [vmem:[#allocation21_spill] sm:$0xff] %v2908_v23  ;;  %3331 = vst [vmem:[#allocation22_spill] sm:$0xff] %v2910_v24  ;;  %v2916_v26 = vld [vmem:[#allocation3 + $0x50] sm:$0xff]  ;;  %v2920_v27 = vld [vmem:[#allocation3 + $0x58] sm:$0xff] }
  0x52   :  { %2190 = vmatpush3.msra.mxu0 %v193_v5  ;;  %3332 = vst [vmem:[#allocation23_spill] sm:$0xff] %v2914_v25  ;;  %3333 = vst [vmem:[#allocation24_spill] sm:$0xff] %v2916_v26  ;;  %v2922_v28 = vld [vmem:[#allocation3 + $0x60] sm:$0xff]  ;;  %v2926_v29 = vld [vmem:[#allocation3 + $0x68] sm:$0xff] }
  0x53   :  { %2191 = vmatprep.subr.mxu0 %v192_v6  ;;  %3334 = vst [vmem:[#allocation25_spill] sm:$0xff] %v2920_v27  ;;  %3335 = vst [vmem:[#allocation26_spill] sm:$0xff] %v2922_v28  ;;  %v2928_v30 = vld [vmem:[#allocation3 + $0x70] sm:$0xff]  ;;  %v2932_v31 = vld [vmem:[#allocation3 + $0x78] sm:$0xff] }
  0x54   :  { %2192 = vmatpush3.msra.mxu0 %v192_v6  ;;  %3336 = vst [vmem:[#allocation27_spill] sm:$0xff] %v2926_v29  ;;  %3337 = vst [vmem:[#allocation28_spill] sm:$0xff] %v2928_v30  ;;  %v2935_v32 = vld [vmem:[#allocation6] sm:$0xff]  ;;  %v574_v33 = vld [vmem:[#allocation9 + $0xf8] sm:$0xff] }
  0x55   :  { %2193 = vmatprep.subr.mxu0 %v191_v7  ;;  %3338 = vst [vmem:[#allocation29_spill] sm:$0xff] %v2932_v31  ;;  %3339 = vst [vmem:[#allocation30_spill] sm:$0xff] %v2935_v32  ;;  %2269 = vmatprep.mubr.f32.mxu1 %v2935_v32  ;;  %v558_v34 = vld [vmem:[#allocation9 + $0x78] sm:$0xff]  ;;  %v573_v35 = vld [vmem:[#allocation9 + $0xf0] sm:$0xff] }
  0x56   :  { %2194 = vmatpush3.msra.mxu0 %v191_v7  ;;  %v557_v36 = vld [vmem:[#allocation9 + $0x70] sm:$0xff]  ;;  %v572_v37 = vld [vmem:[#allocation9 + $0xe8] sm:$0xff]  ;;  %v571_v39 = vld [vmem:[#allocation9 + $0xe0] sm:$0xff] }
  0x57   :  { %2195 = vmatprep.subr.mxu0 %v190_v8  ;;  %v556_v38 = vld [vmem:[#allocation9 + $0x68] sm:$0xff]  ;;  %v555_v40 = vld [vmem:[#allocation9 + $0x60] sm:$0xff]  ;;  %v570_v41 = vld [vmem:[#allocation9 + $0xd8] sm:$0xff] }
  0x58   :  { %2196 = vmatpush3.msra.mxu0 %v190_v8  ;;  %v554_v42 = vld [vmem:[#allocation9 + $0x58] sm:$0xff]  ;;  %v569_v43 = vld [vmem:[#allocation9 + $0xd0] sm:$0xff]  ;;  %v568_v45 = vld [vmem:[#allocation9 + $0xc8] sm:$0xff] }
  0x59   :  { %2197 = vmatprep.subr.mxu0 %v189_v9  ;;  %v553_v44 = vld [vmem:[#allocation9 + $0x50] sm:$0xff]  ;;  %v552_v46 = vld [vmem:[#allocation9 + $0x48] sm:$0xff]  ;;  %v567_v47 = vld [vmem:[#allocation9 + $0xc0] sm:$0xff] }
  0x5a   :  { %2198 = vmatpush3.msra.mxu0 %v189_v9  ;;  %v551_v48 = vld [vmem:[#allocation9 + $0x40] sm:$0xff]  ;;  %v566_v49 = vld [vmem:[#allocation9 + $0xb8] sm:$0xff]  ;;  %v565_v51 = vld [vmem:[#allocation9 + $0xb0] sm:$0xff] }
  0x5b   :  { %2199 = vmatprep.subr.mxu0 %v188_v10  ;;  %v550_v50 = vld [vmem:[#allocation9 + $0x38] sm:$0xff]  ;;  %v549_v52 = vld [vmem:[#allocation9 + $0x30] sm:$0xff]  ;;  %v564_v53 = vld [vmem:[#allocation9 + $0xa8] sm:$0xff] }
  0x5c   :  { %2200 = vmatpush3.msra.mxu0 %v188_v10  ;;  %v548_v54 = vld [vmem:[#allocation9 + $0x28] sm:$0xff]  ;;  %v563_v55 = vld [vmem:[#allocation9 + $0xa0] sm:$0xff]  ;;  %v562_v57 = vld [vmem:[#allocation9 + $0x98] sm:$0xff] }
  0x5d   :  { %2201 = vmatprep.subr.mxu0 %v187_v11  ;;  %v547_v56 = vld [vmem:[#allocation9 + $0x20] sm:$0xff]  ;;  %v546_v58 = vld [vmem:[#allocation9 + $0x18] sm:$0xff] }
  0x5e   :  { %2202 = vmatpush3.msra.mxu0 %v187_v11 }
  0x5f   :  { %2203 = vmatprep.subr.mxu0 %v186_v12 }
  0x60   :  { %2204 = vmatpush3.msra.mxu0 %v186_v12  ;;  %v2938_v12 = vld [vmem:[#allocation6 + $0x8] sm:$0xff] }
  0x61   :  { %2205 = vmatprep.subr.mxu0 %v185_v13 }
  0x62   :  { %2206 = vmatpush3.msra.mxu0 %v185_v13  ;;  %v2940_v13 = vld [vmem:[#allocation6 + $0x10] sm:$0xff] }
  0x63   :  { %2207 = vmatprep.subr.mxu0 %v184_v14 }
  0x64   :  { %2208 = vmatpush3.msra.mxu0 %v184_v14  ;;  %v2944_v14 = vld [vmem:[#allocation6 + $0x18] sm:$0xff] }
  0x65   :  { %2209 = vmatprep.subr.mxu0 %v183_v15 }
  0x66   :  { %2210 = vmatpush3.msra.mxu0 %v183_v15  ;;  %v2946_v15 = vld [vmem:[#allocation6 + $0x20] sm:$0xff] }
  0x67   :  { %2211 = vmatprep.subr.mxu0 %v182_v16 }
  0x68   :  { %2212 = vmatpush3.msra.mxu0 %v182_v16  ;;  %v2950_v16 = vld [vmem:[#allocation6 + $0x28] sm:$0xff] }
  0x69   :  { %2214 = vmatmul.mubr.f32.vlgmr.msra.gmra.mxu0 %v2890_v17  ;;  %1893 = vmatprep.subr.mxu0 %v574_v33  ;;  %v2952_v33 = vld [vmem:[#allocation6 + $0x30] sm:$0xff] }
  0x6a   :  { %2216 = vmatprep.mubr.f32.mxu0 %v2892_v18  ;;  %1894 = vmatpush3.msra.mxu0 %v558_v34  ;;  %v2956_v34 = vld [vmem:[#allocation6 + $0x38] sm:$0xff] }
  0x6b   :  { %1895 = vmatprep.subr.mxu0 %v573_v35  ;;  %v2958_v35 = vld [vmem:[#allocation6 + $0x40] sm:$0xff] }
  0x6c   :  { %1896 = vmatpush3.msra.mxu0 %v557_v36  ;;  %v2962_v36 = vld [vmem:[#allocation6 + $0x48] sm:$0xff] }
  0x6d   :  { %2217 = vmatmul.mubr.f32.gmra.mxu0 %v2896_v19  ;;  %1897 = vmatprep.subr.mxu0 %v572_v37  ;;  %v2964_v37 = vld [vmem:[#allocation6 + $0x50] sm:$0xff] }
  0x6e   :  { %2219 = vmatprep.mubr.f32.mxu0 %v2898_v20  ;;  %1898 = vmatpush3.msra.mxu0 %v556_v38  ;;  %v2968_v38 = vld [vmem:[#allocation6 + $0x58] sm:$0xff] }
  0x6f   :  { %1899 = vmatprep.subr.mxu0 %v571_v39  ;;  %v2970_v39 = vld [vmem:[#allocation6 + $0x60] sm:$0xff] }
  0x70   :  { %1900 = vmatpush3.msra.mxu0 %v555_v40  ;;  %v2974_v40 = vld [vmem:[#allocation6 + $0x68] sm:$0xff] }
  0x71   :  { %2220 = vmatmul.mubr.f32.gmra.mxu0 %v2902_v21  ;;  %1901 = vmatprep.subr.mxu0 %v570_v41  ;;  %v2976_v41 = vld [vmem:[#allocation6 + $0x70] sm:$0xff] }
  0x72   :  { %2222 = vmatprep.mubr.f32.mxu0 %v2904_v22  ;;  %1902 = vmatpush3.msra.mxu0 %v554_v42  ;;  %v2980_v42 = vld [vmem:[#allocation6 + $0x78] sm:$0xff] }
  0x73   :  { %1903 = vmatprep.subr.mxu0 %v569_v43  ;;  %v561_v43 = vld [vmem:[#allocation9 + $0x90] sm:$0xff] }
  0x74   :  { %1904 = vmatpush3.msra.mxu0 %v553_v44  ;;  %v545_v44 = vld [vmem:[#allocation9 + $0x10] sm:$0xff] }
  0x75   :  { %2223 = vmatmul.mubr.f32.gmra.mxu0 %v2908_v23  ;;  %1905 = vmatprep.subr.mxu0 %v568_v45  ;;  %v560_v45 = vld [vmem:[#allocation9 + $0x88] sm:$0xff] }
  0x76   :  { %2225 = vmatprep.mubr.f32.mxu0 %v2910_v24  ;;  %1906 = vmatpush3.msra.mxu0 %v552_v46  ;;  %v544_v46 = vld [vmem:[#allocation9 + $0x8] sm:$0xff] }
  0x77   :  { %1907 = vmatprep.subr.mxu0 %v567_v47  ;;  %v559_v47 = vld [vmem:[#allocation9 + $0x80] sm:$0xff] }
  0x78   :  { %1908 = vmatpush3.msra.mxu0 %v551_v48  ;;  %v543_v48 = vld [vmem:[#allocation9] sm:$0xff] }
  0x79   :  { %2226 = vmatmul.mubr.f32.gmra.mxu0 %v2914_v25  ;;  %1909 = vmatprep.subr.mxu0 %v566_v49 }
  0x7a   :  { %2228 = vmatprep.mubr.f32.mxu0 %v2916_v26  ;;  %1910 = vmatpush3.msra.mxu0 %v550_v50  ;;  %v1825_v50 = vld [vmem:[%s3300_s3] ss:$0 sm:$0xff] }
  0x7b   :  { %1911 = vmatprep.subr.mxu0 %v565_v51 }
  0x7c   :  { %1912 = vmatpush3.msra.mxu0 %v549_v52 }
  0x7d   :  { %2229 = vmatmul.mubr.f32.gmra.mxu0 %v2920_v27  ;;  %1913 = vmatprep.subr.mxu0 %v564_v53 }
  0x7e   :  { %2231 = vmatprep.mubr.f32.mxu0 %v2922_v28  ;;  %1914 = vmatpush3.msra.mxu0 %v548_v54 }
  0x7f   :  { %1915 = vmatprep.subr.mxu0 %v563_v55 }
  0x80   :  { %1916 = vmatpush3.msra.mxu0 %v547_v56 }
  0x81   :  { %2232 = vmatmul.mubr.f32.gmra.mxu0 %v2926_v29  ;;  %1917 = vmatprep.subr.mxu0 %v562_v57 }
  0x82   :  { %2234 = vmatprep.mubr.f32.mxu0 %v2928_v30  ;;  %1918 = vmatpush3.msra.mxu0 %v546_v58 }
  0x83   :  { %1919 = vmatprep.subr.mxu0 %v561_v43 }
  0x84   :  { %1920 = vmatpush3.msra.mxu0 %v545_v44 }
  0x85   :  { %2235 = vmatmul.mubr.f32.gmra.mxu0 %v2932_v31  ;;  %1921 = vmatprep.subr.mxu0 %v560_v45 }
  0x86   :  { %1922 = vmatpush3.msra.mxu0 %v544_v46 }
  0x87   :  { %1923 = vmatprep.subr.mxu0 %v559_v47 }
  0x88   :  { %1924 = vmatpush3.msra.mxu0 %v543_v48 }
 0x129   :  { %v2215_v59 = vpop.f32.mrf.mxu0 }
 0x12b   :  { %v264_v60 = vpop.f32.mrf.mxu0 }
 0x12d   :  { %v2218_v61 = vpop.f32.mrf.mxu0 }
 0x12f   :  { %v274_v62 = vpop.f32.mrf.mxu0 }
 0x131   :  { %v2221_v63 = vpop.f32.mrf.mxu0 }
 0x133   :  { %v284_v0 = vpop.f32.mrf.mxu0 }
 0x135   :  { %v2224_v1 = vpop.f32.mrf.mxu0 }
 0x137   :  { %v294_v2 = vpop.f32.mrf.mxu0 }
 0x139   :  { %v2227_v3 = vpop.f32.mrf.mxu0 }
 0x13b   :  { %v304_v5 = vpop.f32.mrf.mxu0 }
 0x13d   :  { %v2230_v6 = vpop.f32.mrf.mxu0 }
 0x13f   :  { %v314_v7 = vpop.f32.mrf.mxu0 }
 0x141   :  { %v2233_v8 = vpop.f32.mrf.mxu0 }
 0x143   :  { %v324_v9 = vpop.f32.mrf.mxu0 }
 0x145   :  { %v2236_v10 = vpop.f32.mrf.mxu0 }
 0x146   :  { %2237 = vmatprep.subr.mxu1 %v2236_v10 }
 0x147   :  { %v334_v11 = vpop.f32.mrf.mxu0  ;;  %2238 = vmatpush3.msra.mxu1 %v2236_v10 }
 0x148   :  { %2239 = vmatprep.subr.mxu1 %v334_v11 }
 0x149   :  { %2240 = vmatpush3.msra.mxu1 %v334_v11 }
 0x14a   :  { %2241 = vmatprep.subr.mxu1 %v2233_v8 }
 0x14b   :  { %2242 = vmatpush3.msra.mxu1 %v2233_v8 }
 0x14c   :  { %2243 = vmatprep.subr.mxu1 %v324_v9 }
 0x14d   :  { %2244 = vmatpush3.msra.mxu1 %v324_v9 }
 0x14e   :  { %2245 = vmatprep.subr.mxu1 %v2230_v6 }
 0x14f   :  { %2246 = vmatpush3.msra.mxu1 %v2230_v6 }
 0x150   :  { %2247 = vmatprep.subr.mxu1 %v314_v7 }
 0x151   :  { %2248 = vmatpush3.msra.mxu1 %v314_v7 }
 0x152   :  { %2249 = vmatprep.subr.mxu1 %v2227_v3 }
 0x153   :  { %2250 = vmatpush3.msra.mxu1 %v2227_v3 }
 0x154   :  { %2251 = vmatprep.subr.mxu1 %v304_v5 }
 0x155   :  { %2252 = vmatpush3.msra.mxu1 %v304_v5 }
 0x156   :  { %2253 = vmatprep.subr.mxu1 %v2224_v1 }
 0x157   :  { %2254 = vmatpush3.msra.mxu1 %v2224_v1 }
 0x158   :  { %2255 = vmatprep.subr.mxu1 %v294_v2 }
 0x159   :  { %2256 = vmatpush3.msra.mxu1 %v294_v2 }
 0x15a   :  { %2257 = vmatprep.subr.mxu1 %v2221_v63 }
 0x15b   :  { %2258 = vmatpush3.msra.mxu1 %v2221_v63 }
 0x15c   :  { %2259 = vmatprep.subr.mxu1 %v284_v0 }
 0x15d   :  { %2260 = vmatpush3.msra.mxu1 %v284_v0 }
 0x15e   :  { %2261 = vmatprep.subr.mxu1 %v2218_v61 }
 0x15f   :  { %2262 = vmatpush3.msra.mxu1 %v2218_v61 }
 0x160   :  { %2263 = vmatprep.subr.mxu1 %v274_v62 }
 0x161   :  { %2264 = vmatpush3.msra.mxu1 %v274_v62 }
 0x162   :  { %2265 = vmatprep.subr.mxu1 %v2215_v59 }
 0x163   :  { %2266 = vmatpush3.msra.mxu1 %v2215_v59 }
 0x164   :  { %2267 = vmatprep.subr.mxu1 %v264_v60 }
 0x165   :  { %2268 = vmatpush3.msra.mxu1 %v264_v60 }
 0x166   :  { %2270 = vmatmul.mubr.f32.vlgmr.msra.gmra.mxu1 %v2938_v12 }
 0x167   :  { %2272 = vmatprep.mubr.f32.mxu1 %v2940_v13 }
 0x16a   :  { %2273 = vmatmul.mubr.f32.gmra.mxu1 %v2944_v14 }
 0x16b   :  { %2275 = vmatprep.mubr.f32.mxu1 %v2946_v15 }
 0x16e   :  { %2276 = vmatmul.mubr.f32.gmra.mxu1 %v2950_v16 }
 0x16f   :  { %2278 = vmatprep.mubr.f32.mxu1 %v2952_v33 }
 0x172   :  { %2279 = vmatmul.mubr.f32.gmra.mxu1 %v2956_v34 }
 0x173   :  { %2281 = vmatprep.mubr.f32.mxu1 %v2958_v35 }
 0x176   :  { %2282 = vmatmul.mubr.f32.gmra.mxu1 %v2962_v36 }
 0x177   :  { %2284 = vmatprep.mubr.f32.mxu1 %v2964_v37 }
 0x17a   :  { %2285 = vmatmul.mubr.f32.gmra.mxu1 %v2968_v38 }
 0x17b   :  { %2287 = vmatprep.mubr.f32.mxu1 %v2970_v39 }
 0x17e   :  { %2288 = vmatmul.mubr.f32.gmra.mxu1 %v2974_v40 }
 0x17f   :  { %2290 = vmatprep.mubr.f32.mxu1 %v2976_v41 }
 0x182   :  { %2291 = vmatmul.mubr.f32.gmra.mxu1 %v2980_v42 }
 0x183   :  { %2325 = vmatprep.mubr.f32.mxu1 %v2935_v32 }
 0x226   :  { %v2271_v49 = vpop.f32.mrf.mxu1 }
 0x227   :  { %v2989_v54 = vadd.f32 %v2271_v49, %v1825_v50 }
 0x228   :  { %v416_v51 = vpop.f32.mrf.mxu1 }
 0x229   :  { %v2987_v52 = vadd.f32 %v1825_v50, %v416_v51 }
 0x22a   :  { %v2274_v53 = vpop.f32.mrf.mxu1 }
 0x22b   :  { %639 = vmatprep.mubr.f32.mxu0 %v2987_v52  ;;  %v2998_v59 = vadd.f32 %v2274_v53, %v1825_v50 }
 0x22c   :  { %640 = vmatmul.mubr.f32.vlgmr.msra.gmra.mxu0 %v2887_v4  ;;  %v426_v55 = vpop.f32.mrf.mxu1 }
 0x22d   :  { %644 = vmatprep.mubr.f32.mxu0 %v2989_v54  ;;  %v2994_v56 = vadd.f32 %v1825_v50, %v426_v55 }
 0x22e   :  { %v2277_v57 = vpop.f32.mrf.mxu1 }
 0x22f   :  { %v3006_v63 = vadd.f32 %v2277_v57, %v1825_v50 }
 0x230   :  { %645 = vmatmul.mubr.f32.gmra.mxu0 %v2890_v17  ;;  %v436_v58 = vpop.f32.mrf.mxu1 }
 0x231   :  { %649 = vmatprep.mubr.f32.mxu0 %v2994_v56  ;;  %v3002_v60 = vadd.f32 %v1825_v50, %v436_v58 }
 0x232   :  { %v2280_v61 = vpop.f32.mrf.mxu1 }
 0x233   :  { %v3014_v3 = vadd.f32 %v2280_v61, %v1825_v50 }
 0x234   :  { %650 = vmatmul.mubr.f32.gmra.mxu0 %v2892_v18  ;;  %v446_v62 = vpop.f32.mrf.mxu1 }
 0x235   :  { %654 = vmatprep.mubr.f32.mxu0 %v2998_v59  ;;  %v3010_v0 = vadd.f32 %v1825_v50, %v446_v62  ;;  %3341 = vst [vmem:[#allocation32_spill] sm:$0xff] %v3014_v3 }
 0x236   :  { %v2283_v1 = vpop.f32.mrf.mxu1 }
 0x237   :  { %3340 = vst [vmem:[#allocation31_spill] sm:$0xff] %v3010_v0  ;;  %v3022_v8 = vadd.f32 %v2283_v1, %v1825_v50 }
 0x238   :  { %655 = vmatmul.mubr.f32.gmra.mxu0 %v2896_v19  ;;  %v456_v2 = vpop.f32.mrf.mxu1 }
 0x239   :  { %659 = vmatprep.mubr.f32.mxu0 %v3002_v60  ;;  %v3018_v5 = vadd.f32 %v1825_v50, %v456_v2  ;;  %3343 = vst [vmem:[#allocation34_spill] sm:$0xff] %v3022_v8 }
 0x23a   :  { %v2286_v6 = vpop.f32.mrf.mxu1 }
 0x23b   :  { %3342 = vst [vmem:[#allocation33_spill] sm:$0xff] %v3018_v5  ;;  %v3030_v43 = vadd.f32 %v2286_v6, %v1825_v50 }
 0x23c   :  { %660 = vmatmul.mubr.f32.gmra.mxu0 %v2898_v20  ;;  %v466_v7 = vpop.f32.mrf.mxu1 }
 0x23d   :  { %664 = vmatprep.mubr.f32.mxu0 %v3006_v63  ;;  %v3026_v9 = vadd.f32 %v1825_v50, %v466_v7  ;;  %3345 = vst [vmem:[#allocation36_spill] sm:$0xff] %v3030_v43 }
 0x23e   :  { %v2289_v10 = vpop.f32.mrf.mxu1 }
 0x23f   :  { %3344 = vst [vmem:[#allocation35_spill] sm:$0xff] %v3026_v9  ;;  %v3038_v47 = vadd.f32 %v2289_v10, %v1825_v50 }
 0x240   :  { %665 = vmatmul.mubr.f32.gmra.mxu0 %v2902_v21  ;;  %v476_v11 = vpop.f32.mrf.mxu1 }
 0x241   :  { %669 = vmatprep.mubr.f32.mxu0 %v3010_v0  ;;  %v3034_v44 = vadd.f32 %v1825_v50, %v476_v11  ;;  %3347 = vst [vmem:[#allocation38_spill] sm:$0xff] %v3038_v47 }
 0x242   :  { %v2292_v45 = vpop.f32.mrf.mxu1 }
 0x243   :  { %3346 = vst [vmem:[#allocation37_spill] sm:$0xff] %v3034_v44  ;;  %v3046_v49 = vadd.f32 %v2292_v45, %v1825_v50 }
 0x244   :  { %670 = vmatmul.mubr.f32.gmra.mxu0 %v2904_v22  ;;  %v486_v46 = vpop.f32.mrf.mxu1 }
 0x245   :  { %674 = vmatprep.mubr.f32.mxu0 %v3014_v3  ;;  %v3042_v48 = vadd.f32 %v1825_v50, %v486_v46  ;;  %3349 = vst [vmem:[#allocation40_spill] sm:$0xff] %v3046_v49  ;;  %v978_v3 = vld [vmem:[#allocation11 + $0x150] sm:$0xff] }
 0x247   :  { %3348 = vst [vmem:[#allocation39_spill] sm:$0xff] %v3042_v48 }
 0x248   :  { %675 = vmatmul.mubr.f32.gmra.mxu0 %v2908_v23 }
 0x249   :  { %679 = vmatprep.mubr.f32.mxu0 %v3018_v5  ;;  %v979_v5 = vld [vmem:[#allocation11 + $0x158] sm:$0xff] }
 0x24c   :  { %680 = vmatmul.mubr.f32.gmra.mxu0 %v2910_v24 }
 0x24d   :  { %684 = vmatprep.mubr.f32.mxu0 %v3022_v8  ;;  %v980_v8 = vld [vmem:[#allocation11 + $0x160] sm:$0xff] }
 0x250   :  { %685 = vmatmul.mubr.f32.gmra.mxu0 %v2914_v25 }
 0x251   :  { %689 = vmatprep.mubr.f32.mxu0 %v3026_v9  ;;  %v981_v9 = vld [vmem:[#allocation11 + $0x168] sm:$0xff] }
 0x254   :  { %690 = vmatmul.mubr.f32.gmra.mxu0 %v2916_v26 }
 0x255   :  { %694 = vmatprep.mubr.f32.mxu0 %v3030_v43  ;;  %v982_v43 = vld [vmem:[#allocation11 + $0x170] sm:$0xff] }
 0x258   :  { %695 = vmatmul.mubr.f32.gmra.mxu0 %v2920_v27  ;;  %v983_v27 = vld [vmem:[#allocation11 + $0x178] sm:$0xff] }
 0x259   :  { %699 = vmatprep.mubr.f32.mxu0 %v3034_v44  ;;  %2349 = vmatprep.subr.mxu0 %v983_v27 }
 0x25a   :  { %2350 = vmatpush3.msra.mxu0 %v983_v27  ;;  %v977_v27 = vld [vmem:[#allocation11 + $0x148] sm:$0xff] }
 0x25b   :  { %2351 = vmatprep.subr.mxu0 %v982_v43 }
 0x25c   :  { %700 = vmatmul.mubr.f32.gmra.mxu0 %v2922_v28 }
 0x25d   :  { %704 = vmatprep.mubr.f32.mxu0 %v3038_v47  ;;  %2352 = vmatpush3.msra.mxu0 %v982_v43  ;;  %v966_v43 = vld [vmem:[#allocation11 + $0xf0] sm:$0xff] }
 0x25e   :  { %2353 = vmatprep.subr.mxu0 %v981_v9 }
 0x25f   :  { %2354 = vmatpush3.msra.mxu0 %v981_v9  ;;  %v951_v9 = vld [vmem:[#allocation11 + $0x78] sm:$0xff] }
 0x260   :  { %705 = vmatmul.mubr.f32.gmra.mxu0 %v2926_v29  ;;  %2355 = vmatprep.subr.mxu0 %v980_v8 }
 0x261   :  { %709 = vmatprep.mubr.f32.mxu0 %v3042_v48  ;;  %2356 = vmatpush3.msra.mxu0 %v980_v8  ;;  %v967_v8 = vld [vmem:[#allocation11 + $0xf8] sm:$0xff] }
 0x262   :  { %2357 = vmatprep.subr.mxu0 %v979_v5 }
 0x263   :  { %2358 = vmatpush3.msra.mxu0 %v979_v5 }
 0x264   :  { %710 = vmatmul.mubr.f32.gmra.mxu0 %v2928_v30  ;;  %2359 = vmatprep.subr.mxu0 %v978_v3 }
 0x265   :  { %714 = vmatprep.mubr.f32.mxu0 %v3046_v49  ;;  %2360 = vmatpush3.msra.mxu0 %v978_v3 }
 0x266   :  { %2361 = vmatprep.subr.mxu0 %v977_v27 }
 0x267   :  { %2362 = vmatpush3.msra.mxu0 %v977_v27  ;;  %v3365_v27 = vld [vmem:[#allocation27_spill] sm:$0xff] }
 0x268   :  { %715 = vmatmul.mubr.f32.gmra.mxu0 %v2932_v31 }
 0x2ec   :  { %v1925_v51 = vpop.f32.mrf.mxu0 }
 0x2ee   :  { %v1926_v53 = vpop.f32.mrf.mxu0 }
 0x2ef   :  { %v3051_v55 = vadd.f32 %v1926_v53, %v1925_v51 }
 0x2f0   :  { %v1928_v57 = vpop.f32.mrf.mxu0 }
 0x2f2   :  { %v1929_v58 = vpop.f32.mrf.mxu0 }
 0x2f3   :  { %v3053_v61 = vadd.f32 %v1929_v58, %v1928_v57 }
 0x2f4   :  { %v1931_v62 = vpop.f32.mrf.mxu0 }
 0x2f6   :  { %v1932_v1 = vpop.f32.mrf.mxu0 }
 0x2f7   :  { %v3055_v2 = vadd.f32 %v1932_v1, %v1931_v62 }
 0x2f8   :  { %v1934_v50 = vpop.f32.mrf.mxu0 }
 0x2fa   :  { %v1935_v6 = vpop.f32.mrf.mxu0 }
 0x2fb   :  { %v3057_v7 = vadd.f32 %v1935_v6, %v1934_v50 }
 0x2fc   :  { %v1937_v10 = vpop.f32.mrf.mxu0 }
 0x2fe   :  { %v1938_v11 = vpop.f32.mrf.mxu0 }
 0x2ff   :  { %v3059_v45 = vadd.f32 %v1938_v11, %v1937_v10 }
 0x300   :  { %v3061_v46 = vpop.f32.mrf.mxu0 }
 0x302   :  { %v3063_v51 = vpop.f32.mrf.mxu0 }
 0x303   :  { %v1942_v5 = vadd.f32 %v3063_v51, %v3061_v46  ;;  %v959_v46 = vld [vmem:[#allocation11 + $0xb8] sm:$0xff]  ;;  %v958_v51 = vld [vmem:[#allocation11 + $0xb0] sm:$0xff] }
 0x304   :  { %v3065_v53 = vpop.f32.mrf.mxu0 }
 0x306   :  { %v3067_v57 = vpop.f32.mrf.mxu0 }
 0x307   :  { %v1945_v3 = vadd.f32 %v3067_v57, %v3065_v53  ;;  %v957_v53 = vld [vmem:[#allocation11 + $0xa8] sm:$0xff]  ;;  %v956_v57 = vld [vmem:[#allocation11 + $0xa0] sm:$0xff] }
 0x308   :  { %v3069_v58 = vpop.f32.mrf.mxu0 }
 0x30a   :  { %v3071_v62 = vpop.f32.mrf.mxu0 }
 0x30c   :  { %v3073_v1 = vpop.f32.mrf.mxu0 }
 0x30e   :  { %v3075_v50 = vpop.f32.mrf.mxu0 }
 0x310   :  { %v1952_v6 = vpop.f32.mrf.mxu0 }
 0x312   :  { %v1953_v32 = vpop.f32.mrf.mxu0 }
 0x314   :  { %v1955_v10 = vpop.f32.mrf.mxu0 }
 0x316   :  { %v1956_v11 = vpop.f32.mrf.mxu0 }
 0x318   :  { %v1958_v31 = vpop.f32.mrf.mxu0 }
 0x31a   :  { %v1959_v49 = vpop.f32.mrf.mxu0 }
 0x31c   :  { %v1961_v30 = vpop.f32.mrf.mxu0 }
 0x31e   :  { %v1962_v48 = vpop.f32.mrf.mxu0 }
 0x31f   :  { %v1963_v0 = vadd.f32 %v1962_v48, %v1961_v30  ;;  %v1951_v30 = vadd.f32 %v3075_v50, %v3073_v1  ;;  %v949_v48 = vld [vmem:[#allocation11 + $0x68] sm:$0xff]  ;;  %v952_v50 = vld [vmem:[#allocation11 + $0x80] sm:$0xff] }
 0x320   :  { %v1964_v29 = vpop.f32.mrf.mxu0  ;;  %v953_v1 = vld [vmem:[#allocation11 + $0x88] sm:$0xff] }
 0x322   :  { %v1965_v47 = vpop.f32.mrf.mxu0 }
 0x323   :  { %v1966_v22 = vadd.f32 %v1965_v47, %v1964_v29  ;;  %v1954_v29 = vadd.f32 %v1953_v32, %v1952_v6  ;;  %v971_v32 = vld [vmem:[#allocation11 + $0x118] sm:$0xff]  ;;  %v965_v47 = vld [vmem:[#allocation11 + $0xe8] sm:$0xff] }
 0x324   :  { %v1967_v28 = vpop.f32.mrf.mxu0  ;;  %v3362_v6 = vld [vmem:[#allocation37_spill] sm:$0xff] }
 0x326   :  { %v1968_v44 = vpop.f32.mrf.mxu0 }
 0x327   :  { %v1969_v23 = vadd.f32 %v1968_v44, %v1967_v28  ;;  %v1957_v28 = vadd.f32 %v1956_v11, %v1955_v10  ;;  %v950_v44 = vld [vmem:[#allocation11 + $0x70] sm:$0xff] }
 0x328   :  { %v1970_v26 = vpop.f32.mrf.mxu0  ;;  %v3363_v10 = vld [vmem:[#allocation26_spill] sm:$0xff] }
 0x329   :  { %v3364_v11 = vld [vmem:[#allocation38_spill] sm:$0xff] }
 0x32a   :  { %v1971_v25 = vpop.f32.mrf.mxu0 }
 0x32b   :  { %v1972_v24 = vadd.f32 %v1971_v25, %v1970_v26  ;;  %v976_v25 = vld [vmem:[#allocation11 + $0x140] sm:$0xff]  ;;  %v1960_v26 = vadd.f32 %v1959_v49, %v1958_v31 }
 0x32c   :  { %2363 = vmatprep.subr.mxu0 %v976_v25  ;;  %v972_v31 = vld [vmem:[#allocation11 + $0x120] sm:$0xff] }
 0x32d   :  { %2293 = vmatprep.subr.mxu1 %v1972_v24  ;;  %2364 = vmatpush3.msra.mxu0 %v976_v25  ;;  %v964_v49 = vld [vmem:[#allocation11 + $0xe0] sm:$0xff]  ;;  %v3366_v25 = vld [vmem:[#allocation39_spill] sm:$0xff] }
 0x32e   :  { %2294 = vmatpush3.msra.mxu1 %v1972_v24  ;;  %v975_v24 = vld [vmem:[#allocation11 + $0x138] sm:$0xff] }
 0x32f   :  { %2295 = vmatprep.subr.mxu1 %v1969_v23  ;;  %2365 = vmatprep.subr.mxu0 %v975_v24 }
 0x330   :  { %2296 = vmatpush3.msra.mxu1 %v1969_v23  ;;  %v974_v23 = vld [vmem:[#allocation11 + $0x130] sm:$0xff]  ;;  %2366 = vmatpush3.msra.mxu0 %v975_v24  ;;  %v3368_v24 = vld [vmem:[#allocation40_spill] sm:$0xff] }
 0x331   :  { %2297 = vmatprep.subr.mxu1 %v1966_v22  ;;  %2367 = vmatprep.subr.mxu0 %v974_v23 }
 0x332   :  { %2298 = vmatpush3.msra.mxu1 %v1966_v22  ;;  %v973_v22 = vld [vmem:[#allocation11 + $0x128] sm:$0xff]  ;;  %2368 = vmatpush3.msra.mxu0 %v974_v23  ;;  %v3370_v23 = vld [vmem:[#allocation30_spill] sm:$0xff] }
 0x333   :  { %2299 = vmatprep.subr.mxu1 %v1963_v0  ;;  %2369 = vmatprep.subr.mxu0 %v973_v22 }
 0x334   :  { %2300 = vmatpush3.msra.mxu1 %v1963_v0  ;;  %v1948_v0 = vadd.f32 %v3071_v62, %v3069_v58  ;;  %2370 = vmatpush3.msra.mxu0 %v973_v22  ;;  %v955_v58 = vld [vmem:[#allocation11 + $0x98] sm:$0xff]  ;;  %v954_v62 = vld [vmem:[#allocation11 + $0x90] sm:$0xff] }
 0x335   :  { %2301 = vmatprep.subr.mxu1 %v1960_v26  ;;  %2371 = vmatprep.subr.mxu0 %v972_v31 }
 0x336   :  { %2302 = vmatpush3.msra.mxu1 %v1960_v26  ;;  %2372 = vmatpush3.msra.mxu0 %v972_v31  ;;  %v3367_v26 = vld [vmem:[#allocation28_spill] sm:$0xff] }
 0x337   :  { %2303 = vmatprep.subr.mxu1 %v1957_v28  ;;  %2373 = vmatprep.subr.mxu0 %v971_v32 }
 0x338   :  { %2304 = vmatpush3.msra.mxu1 %v1957_v28  ;;  %2374 = vmatpush3.msra.mxu0 %v971_v32  ;;  %v3369_v28 = vld [vmem:[#allocation29_spill] sm:$0xff] }
 0x339   :  { %2305 = vmatprep.subr.mxu1 %v1954_v29 }
 0x33a   :  { %2306 = vmatpush3.msra.mxu1 %v1954_v29  ;;  %v1312_v29 = vld [vmem:[#allocation12 + $0x78] sm:$0xff] }
 0x33b   :  { %2307 = vmatprep.subr.mxu1 %v1951_v30 }
 0x33c   :  { %2308 = vmatpush3.msra.mxu1 %v1951_v30  ;;  %v1826_v30 = vld [vmem:[%s3302_s5] ss:$0 sm:$0xff] }
 0x33d   :  { %2309 = vmatprep.subr.mxu1 %v1948_v0 }
 0x33e   :  { %2310 = vmatpush3.msra.mxu1 %v1948_v0 }
 0x33f   :  { %2311 = vmatprep.subr.mxu1 %v1945_v3 }
 0x340   :  { %2312 = vmatpush3.msra.mxu1 %v1945_v3 }
 0x341   :  { %2313 = vmatprep.subr.mxu1 %v1942_v5 }
 0x342   :  { %2314 = vmatpush3.msra.mxu1 %v1942_v5  ;;  %v1311_v5 = vld [vmem:[#allocation12 + $0x70] sm:$0xff] }
 0x343   :  { %2315 = vmatprep.subr.mxu1 %v3059_v45 }
 0x344   :  { %2316 = vmatpush3.msra.mxu1 %v3059_v45  ;;  %v960_v45 = vld [vmem:[#allocation11 + $0xc0] sm:$0xff] }
 0x345   :  { %2317 = vmatprep.subr.mxu1 %v3057_v7 }
 0x346   :  { %2318 = vmatpush3.msra.mxu1 %v3057_v7  ;;  %v961_v7 = vld [vmem:[#allocation11 + $0xc8] sm:$0xff] }
 0x347   :  { %2319 = vmatprep.subr.mxu1 %v3055_v2 }
 0x348   :  { %2320 = vmatpush3.msra.mxu1 %v3055_v2  ;;  %v962_v2 = vld [vmem:[#allocation11 + $0xd0] sm:$0xff] }
 0x349   :  { %2321 = vmatprep.subr.mxu1 %v3053_v61 }
 0x34a   :  { %2322 = vmatpush3.msra.mxu1 %v3053_v61  ;;  %v948_v61 = vld [vmem:[#allocation11 + $0x60] sm:$0xff] }
 0x34b   :  { %2323 = vmatprep.subr.mxu1 %v3051_v55 }
 0x34c   :  { %2324 = vmatpush3.msra.mxu1 %v3051_v55  ;;  %v963_v55 = vld [vmem:[#allocation11 + $0xd8] sm:$0xff] }
 0x34d   :  { %2326 = vmatmul.mubr.f32.vlgmr.msra.gmra.mxu1 %v2938_v12  ;;  %2005 = vmatprep.subr.mxu1 %v967_v8  ;;  %v947_v12 = vld [vmem:[#allocation11 + $0x58] sm:$0xff] }
 0x34e   :  { %2006 = vmatpush3.msra.mxu1 %v951_v9  ;;  %2328 = vmatprep.mubr.f32.mxu1 %v2940_v13  ;;  %v946_v13 = vld [vmem:[#allocation11 + $0x50] sm:$0xff] }
 0x34f   :  { %2007 = vmatprep.subr.mxu1 %v966_v43  ;;  %v1310_v43 = vld [vmem:[#allocation12 + $0x68] sm:$0xff] }
 0x350   :  { %2008 = vmatpush3.msra.mxu1 %v950_v44 }
 0x351   :  { %2329 = vmatmul.mubr.f32.gmra.mxu1 %v2944_v14  ;;  %2009 = vmatprep.subr.mxu1 %v965_v47  ;;  %v945_v14 = vld [vmem:[#allocation11 + $0x48] sm:$0xff] }
 0x352   :  { %2010 = vmatpush3.msra.mxu1 %v949_v48  ;;  %2331 = vmatprep.mubr.f32.mxu1 %v2946_v15  ;;  %v944_v15 = vld [vmem:[#allocation11 + $0x40] sm:$0xff] }
 0x353   :  { %2011 = vmatprep.subr.mxu1 %v964_v49  ;;  %v1309_v48 = vld [vmem:[#allocation12 + $0x60] sm:$0xff] }
 0x354   :  { %2012 = vmatpush3.msra.mxu1 %v948_v61 }
 0x355   :  { %2332 = vmatmul.mubr.f32.gmra.mxu1 %v2950_v16  ;;  %2013 = vmatprep.subr.mxu1 %v963_v55  ;;  %v943_v16 = vld [vmem:[#allocation11 + $0x38] sm:$0xff] }
 0x356   :  { %2014 = vmatpush3.msra.mxu1 %v947_v12  ;;  %2334 = vmatprep.mubr.f32.mxu1 %v2952_v33  ;;  %v942_v33 = vld [vmem:[#allocation11 + $0x30] sm:$0xff]  ;;  %v1308_v55 = vld [vmem:[#allocation12 + $0x58] sm:$0xff] }
 0x357   :  { %2015 = vmatprep.subr.mxu1 %v962_v2 }
 0x358   :  { %2016 = vmatpush3.msra.mxu1 %v946_v13  ;;  %v1307_v13 = vld [vmem:[#allocation12 + $0x50] sm:$0xff] }
 0x359   :  { %2335 = vmatmul.mubr.f32.gmra.mxu1 %v2956_v34  ;;  %2017 = vmatprep.subr.mxu1 %v961_v7  ;;  %v941_v34 = vld [vmem:[#allocation11 + $0x28] sm:$0xff] }
 0x35a   :  { %2018 = vmatpush3.msra.mxu1 %v945_v14  ;;  %2337 = vmatprep.mubr.f32.mxu1 %v2958_v35  ;;  %v940_v35 = vld [vmem:[#allocation11 + $0x20] sm:$0xff] }
 0x35b   :  { %2019 = vmatprep.subr.mxu1 %v960_v45 }
 0x35c   :  { %2020 = vmatpush3.msra.mxu1 %v944_v15 }
 0x35d   :  { %2338 = vmatmul.mubr.f32.gmra.mxu1 %v2962_v36  ;;  %2021 = vmatprep.subr.mxu1 %v959_v46  ;;  %v939_v36 = vld [vmem:[#allocation11 + $0x18] sm:$0xff] }
 0x35e   :  { %2022 = vmatpush3.msra.mxu1 %v943_v16  ;;  %2340 = vmatprep.mubr.f32.mxu1 %v2964_v37  ;;  %v938_v37 = vld [vmem:[#allocation11 + $0x10] sm:$0xff] }
 0x35f   :  { %2023 = vmatprep.subr.mxu1 %v958_v51 }
 0x360   :  { %2024 = vmatpush3.msra.mxu1 %v942_v33 }
 0x361   :  { %2341 = vmatmul.mubr.f32.gmra.mxu1 %v2968_v38  ;;  %2025 = vmatprep.subr.mxu1 %v957_v53  ;;  %v937_v38 = vld [vmem:[#allocation11 + $0x8] sm:$0xff] }
 0x362   :  { %2026 = vmatpush3.msra.mxu1 %v941_v34  ;;  %2343 = vmatprep.mubr.f32.mxu1 %v2970_v39  ;;  %v936_v39 = vld [vmem:[#allocation11] sm:$0xff] }
 0x363   :  { %2027 = vmatprep.subr.mxu1 %v956_v57 }
 0x364   :  { %2028 = vmatpush3.msra.mxu1 %v940_v35 }
 0x365   :  { %2344 = vmatmul.mubr.f32.gmra.mxu1 %v2974_v40  ;;  %2029 = vmatprep.subr.mxu1 %v955_v58  ;;  %v3351_v40 = vld [vmem:[#allocation20_spill] sm:$0xff] }
 0x366   :  { %2030 = vmatpush3.msra.mxu1 %v939_v36  ;;  %2346 = vmatprep.mubr.f32.mxu1 %v2976_v41  ;;  %v3353_v41 = vld [vmem:[#allocation21_spill] sm:$0xff] }
 0x367   :  { %2031 = vmatprep.subr.mxu1 %v954_v62 }
 0x368   :  { %2032 = vmatpush3.msra.mxu1 %v938_v37 }
 0x369   :  { %2347 = vmatmul.mubr.f32.gmra.mxu1 %v2980_v42  ;;  %2033 = vmatprep.subr.mxu1 %v953_v1  ;;  %v970_v42 = vld [vmem:[#allocation11 + $0x110] sm:$0xff] }
 0x36a   :  { %2034 = vmatpush3.msra.mxu1 %v937_v38  ;;  %1055 = vmatprep.mubr.f32.mxu1 %v2987_v52  ;;  %v3356_v52 = vld [vmem:[#allocation34_spill] sm:$0xff] }
 0x36b   :  { %2035 = vmatprep.subr.mxu1 %v952_v50  ;;  %2375 = vmatprep.subr.mxu0 %v970_v42 }
 0x36c   :  { %2036 = vmatpush3.msra.mxu1 %v936_v39  ;;  %2376 = vmatpush3.msra.mxu0 %v970_v42  ;;  %v1306_v39 = vld [vmem:[#allocation12 + $0x48] sm:$0xff]  ;;  %v1300_v42 = vld [vmem:[#allocation12 + $0x18] sm:$0xff] }
 0x36d   :  { %1056 = vmatmul.mubr.f32.vlgmr.msra.gmra.mxu1 %v2887_v4  ;;  %v3350_v4 = vld [vmem:[#allocation31_spill] sm:$0xff] }
 0x36e   :  { %1060 = vmatprep.mubr.f32.mxu1 %v2989_v54  ;;  %v3357_v54 = vld [vmem:[#allocation23_spill] sm:$0xff] }
 0x371   :  { %1061 = vmatmul.mubr.f32.gmra.mxu1 %v2890_v17  ;;  %v3352_v17 = vld [vmem:[#allocation32_spill] sm:$0xff] }
 0x372   :  { %1065 = vmatprep.mubr.f32.mxu1 %v2994_v56  ;;  %v3358_v56 = vld [vmem:[#allocation35_spill] sm:$0xff] }
 0x375   :  { %1066 = vmatmul.mubr.f32.gmra.mxu1 %v2892_v18  ;;  %v3354_v18 = vld [vmem:[#allocation33_spill] sm:$0xff] }
 0x376   :  { %1070 = vmatprep.mubr.f32.mxu1 %v2998_v59  ;;  %v3359_v59 = vld [vmem:[#allocation24_spill] sm:$0xff] }
 0x379   :  { %1071 = vmatmul.mubr.f32.gmra.mxu1 %v2896_v19  ;;  %v3355_v19 = vld [vmem:[#allocation22_spill] sm:$0xff] }
 0x37a   :  { %1075 = vmatprep.mubr.f32.mxu1 %v3002_v60  ;;  %v3360_v60 = vld [vmem:[#allocation36_spill] sm:$0xff] }
 0x37d   :  { %1076 = vmatmul.mubr.f32.gmra.mxu1 %v2898_v20  ;;  %v969_v20 = vld [vmem:[#allocation11 + $0x108] sm:$0xff] }
 0x37e   :  { %1080 = vmatprep.mubr.f32.mxu1 %v3006_v63  ;;  %2377 = vmatprep.subr.mxu0 %v969_v20  ;;  %v3361_v63 = vld [vmem:[#allocation25_spill] sm:$0xff] }
 0x37f   :  { %2378 = vmatpush3.msra.mxu0 %v969_v20  ;;  %v1297_v20 = vld [vmem:[#allocation12] sm:$0xff] }
 0x381   :  { %1081 = vmatmul.mubr.f32.gmra.mxu1 %v2902_v21  ;;  %v968_v21 = vld [vmem:[#allocation11 + $0x100] sm:$0xff] }
 0x382   :  { %1085 = vmatprep.mubr.f32.mxu1 %v3350_v4  ;;  %2379 = vmatprep.subr.mxu0 %v968_v21  ;;  %v1305_v4 = vld [vmem:[#allocation12 + $0x40] sm:$0xff] }
 0x383   :  { %2380 = vmatpush3.msra.mxu0 %v968_v21 }
 0x384   :  { %2405 = vmatprep.subr.mxu0 %v1312_v29 }
 0x385   :  { %1086 = vmatmul.mubr.f32.gmra.mxu1 %v3351_v40  ;;  %v1304_v40 = vld [vmem:[#allocation12 + $0x38] sm:$0xff] }
 0x386   :  { %1090 = vmatprep.mubr.f32.mxu1 %v3352_v17  ;;  %v1303_v17 = vld [vmem:[#allocation12 + $0x30] sm:$0xff] }
 0x389   :  { %1091 = vmatmul.mubr.f32.gmra.mxu1 %v3353_v41  ;;  %v1302_v41 = vld [vmem:[#allocation12 + $0x28] sm:$0xff] }
 0x38a   :  { %1095 = vmatprep.mubr.f32.mxu1 %v3354_v18  ;;  %v1301_v18 = vld [vmem:[#allocation12 + $0x20] sm:$0xff] }
 0x38d   :  { %1096 = vmatmul.mubr.f32.gmra.mxu1 %v3355_v19  ;;  %v1299_v19 = vld [vmem:[#allocation12 + $0x10] sm:$0xff] }
 0x38e   :  { %1100 = vmatprep.mubr.f32.mxu1 %v3356_v52  ;;  %v1298_v52 = vld [vmem:[#allocation12 + $0x8] sm:$0xff] }
 0x391   :  { %1101 = vmatmul.mubr.f32.gmra.mxu1 %v3357_v54 }
 0x392   :  { %1105 = vmatprep.mubr.f32.mxu1 %v3358_v56 }
 0x395   :  { %1106 = vmatmul.mubr.f32.gmra.mxu1 %v3359_v59 }
 0x396   :  { %1110 = vmatprep.mubr.f32.mxu1 %v3360_v60 }
 0x399   :  { %1111 = vmatmul.mubr.f32.gmra.mxu1 %v3361_v63 }
 0x39a   :  { %1115 = vmatprep.mubr.f32.mxu1 %v3362_v6 }
 0x39d   :  { %1116 = vmatmul.mubr.f32.gmra.mxu1 %v3363_v10 }
 0x39e   :  { %1120 = vmatprep.mubr.f32.mxu1 %v3364_v11 }
 0x3a1   :  { %1121 = vmatmul.mubr.f32.gmra.mxu1 %v3365_v27 }
 0x3a2   :  { %1125 = vmatprep.mubr.f32.mxu1 %v3366_v25 }
 0x3a5   :  { %1126 = vmatmul.mubr.f32.gmra.mxu1 %v3367_v26 }
 0x3a6   :  { %1130 = vmatprep.mubr.f32.mxu1 %v3368_v24 }
 0x3a9   :  { %1131 = vmatmul.mubr.f32.gmra.mxu1 %v3369_v28 }
 0x3aa   :  { %2493 = vmatprep.mubr.f32.mxu1 %v3370_v23 }
 0x40d   :  { %v2327_v22 = vpop.f32.mrf.mxu1 }
 0x40e   :  { %v799_v32 = vadd.f32 %v2327_v22, %v1826_v30 }
 0x40f   :  { %v793_v31 = vpop.f32.mrf.mxu1 }
 0x410   :  { %v794_v0 = vadd.f32 %v1826_v30, %v793_v31 }
 0x411   :  { %v2330_v3 = vpop.f32.mrf.mxu1 }
 0x412   :  { %2381 = vmatprep.mubr.f32.mxu0 %v794_v0  ;;  %v809_v44 = vadd.f32 %v2330_v3, %v1826_v30 }
 0x413   :  { %v803_v8 = vpop.f32.mrf.mxu1  ;;  %2382 = vmatmul.mubr.f32.vlgmr.msra.gmra.mxu0 %v799_v32 }
 0x414   :  { %v804_v9 = vadd.f32 %v1826_v30, %v803_v8  ;;  %2406 = vmatpush3.msra.mxu0 %v1312_v29 }
 0x415   :  { %v2333_v47 = vpop.f32.mrf.mxu1  ;;  %2407 = vmatprep.subr.mxu0 %v1311_v5 }
 0x416   :  { %2384 = vmatprep.mubr.f32.mxu0 %v804_v9  ;;  %2408 = vmatpush3.msra.mxu0 %v1311_v5  ;;  %v819_v12 = vadd.f32 %v2333_v47, %v1826_v30 }
 0x417   :  { %v813_v49 = vpop.f32.mrf.mxu1  ;;  %2385 = vmatmul.mubr.f32.gmra.mxu0 %v809_v44  ;;  %2409 = vmatprep.subr.mxu0 %v1310_v43 }
 0x418   :  { %v814_v61 = vadd.f32 %v1826_v30, %v813_v49  ;;  %2410 = vmatpush3.msra.mxu0 %v1310_v43 }
 0x419   :  { %v2336_v2 = vpop.f32.mrf.mxu1  ;;  %2411 = vmatprep.subr.mxu0 %v1309_v48 }
 0x41a   :  { %2387 = vmatprep.mubr.f32.mxu0 %v814_v61  ;;  %2412 = vmatpush3.msra.mxu0 %v1309_v48  ;;  %v829_v45 = vadd.f32 %v2336_v2, %v1826_v30  ;;  %v3153_v48 = vld [vmem:[%s3304_s7] ss:$0 sm:$0xff] }
 0x41b   :  { %v823_v7 = vpop.f32.mrf.mxu1  ;;  %2388 = vmatmul.mubr.f32.gmra.mxu0 %v819_v12  ;;  %2413 = vmatprep.subr.mxu0 %v1308_v55 }
 0x41c   :  { %v824_v14 = vadd.f32 %v1826_v30, %v823_v7  ;;  %2414 = vmatpush3.msra.mxu0 %v1308_v55 }
 0x41d   :  { %v2339_v15 = vpop.f32.mrf.mxu1  ;;  %2415 = vmatprep.subr.mxu0 %v1307_v13 }
 0x41e   :  { %2390 = vmatprep.mubr.f32.mxu0 %v824_v14  ;;  %2416 = vmatpush3.msra.mxu0 %v1307_v13  ;;  %v839_v51 = vadd.f32 %v2339_v15, %v1826_v30 }
 0x41f   :  { %v833_v46 = vpop.f32.mrf.mxu1  ;;  %2391 = vmatmul.mubr.f32.gmra.mxu0 %v829_v45  ;;  %2417 = vmatprep.subr.mxu0 %v1306_v39 }
 0x420   :  { %v834_v16 = vadd.f32 %v1826_v30, %v833_v46  ;;  %2418 = vmatpush3.msra.mxu0 %v1306_v39 }
 0x421   :  { %v2342_v33 = vpop.f32.mrf.mxu1  ;;  %2419 = vmatprep.subr.mxu0 %v1305_v4 }
 0x422   :  { %2393 = vmatprep.mubr.f32.mxu0 %v834_v16  ;;  %v849_v57 = vadd.f32 %v2342_v33, %v1826_v30  ;;  %2420 = vmatpush3.msra.mxu0 %v1305_v4 }
 0x423   :  { %v843_v53 = vpop.f32.mrf.mxu1  ;;  %2394 = vmatmul.mubr.f32.gmra.mxu0 %v839_v51  ;;  %2421 = vmatprep.subr.mxu0 %v1304_v40 }
 0x424   :  { %v844_v34 = vadd.f32 %v1826_v30, %v843_v53  ;;  %2422 = vmatpush3.msra.mxu0 %v1304_v40 }
 0x425   :  { %v2345_v35 = vpop.f32.mrf.mxu1  ;;  %2423 = vmatprep.subr.mxu0 %v1303_v17 }
 0x426   :  { %2396 = vmatprep.mubr.f32.mxu0 %v844_v34  ;;  %v859_v62 = vadd.f32 %v2345_v35, %v1826_v30  ;;  %2424 = vmatpush3.msra.mxu0 %v1303_v17 }
 0x427   :  { %v853_v58 = vpop.f32.mrf.mxu1  ;;  %2397 = vmatmul.mubr.f32.gmra.mxu0 %v849_v57  ;;  %2425 = vmatprep.subr.mxu0 %v1302_v41 }
 0x428   :  { %v854_v36 = vadd.f32 %v1826_v30, %v853_v58  ;;  %2426 = vmatpush3.msra.mxu0 %v1302_v41 }
 0x429   :  { %v2348_v37 = vpop.f32.mrf.mxu1  ;;  %2427 = vmatprep.subr.mxu0 %v1301_v18 }
 0x42a   :  { %2399 = vmatprep.mubr.f32.mxu0 %v854_v36  ;;  %v869_v50 = vadd.f32 %v2348_v37, %v1826_v30  ;;  %2428 = vmatpush3.msra.mxu0 %v1301_v18 }
 0x42b   :  { %v863_v1 = vpop.f32.mrf.mxu1  ;;  %2400 = vmatmul.mubr.f32.gmra.mxu0 %v859_v62  ;;  %2429 = vmatprep.subr.mxu0 %v1300_v42 }
 0x42c   :  { %v864_v38 = vadd.f32 %v1826_v30, %v863_v1  ;;  %2430 = vmatpush3.msra.mxu0 %v1300_v42 }
 0x42d   :  { %2431 = vmatprep.subr.mxu0 %v1299_v19  ;;  %v2037_v21 = vpop.f32.mrf.mxu1 }
 0x42e   :  { %2402 = vmatprep.mubr.f32.mxu0 %v864_v38  ;;  %2432 = vmatpush3.msra.mxu0 %v1299_v19 }
 0x42f   :  { %2403 = vmatmul.mubr.f32.gmra.mxu0 %v869_v50  ;;  %2433 = vmatprep.subr.mxu0 %v1298_v52  ;;  %v2038_v54 = vpop.f32.mrf.mxu1 }
 0x430   :  { %2434 = vmatpush3.msra.mxu0 %v1298_v52  ;;  %v2039_v47 = vadd.f32 %v2038_v54, %v2037_v21 }
 0x431   :  { %2435 = vmatprep.subr.mxu0 %v1297_v20  ;;  %v2040_v56 = vpop.f32.mrf.mxu1 }
 0x432   :  { %2436 = vmatpush3.msra.mxu0 %v1297_v20  ;;  %v1058_v13 = vadd.f32 %v2039_v47, %v3153_v48 }
 0x433   :  { %v2041_v59 = vpop.f32.mrf.mxu1 }
 0x434   :  { %v2042_v44 = vadd.f32 %v2041_v59, %v2040_v56 }
 0x435   :  { %v2043_v60 = vpop.f32.mrf.mxu1 }
 0x436   :  { %v1063_v55 = vadd.f32 %v2042_v44, %v3153_v48 }
 0x437   :  { %v2044_v63 = vpop.f32.mrf.mxu1 }
 0x438   :  { %v2045_v2 = vadd.f32 %v2044_v63, %v2043_v60 }
 0x439   :  { %v2046_v6 = vpop.f32.mrf.mxu1 }
 0x43a   :  { %v1068_v53 = vadd.f32 %v2045_v2, %v3153_v48 }
 0x43b   :  { %v2047_v10 = vpop.f32.mrf.mxu1 }
 0x43c   :  { %v2048_v61 = vadd.f32 %v2047_v10, %v2046_v6 }
 0x43d   :  { %v2049_v11 = vpop.f32.mrf.mxu1 }
 0x43e   :  { %v1073_v16 = vadd.f32 %v2048_v61, %v3153_v48 }
 0x43f   :  { %v2050_v27 = vpop.f32.mrf.mxu1 }
 0x440   :  { %v2051_v33 = vadd.f32 %v2050_v27, %v2049_v11 }
 0x441   :  { %v2052_v25 = vpop.f32.mrf.mxu1 }
 0x442   :  { %v1078_v38 = vadd.f32 %v2051_v33, %v3153_v48 }
 0x443   :  { %v2053_v26 = vpop.f32.mrf.mxu1 }
 0x444   :  { %v2054_v46 = vadd.f32 %v2053_v26, %v2052_v25 }
 0x445   :  { %v2055_v24 = vpop.f32.mrf.mxu1 }
 0x446   :  { %v1083_v62 = vadd.f32 %v2054_v46, %v3153_v48 }
 0x447   :  { %v2056_v28 = vpop.f32.mrf.mxu1 }
 0x448   :  { %v2057_v1 = vadd.f32 %v2056_v28, %v2055_v24 }
 0x449   :  { %v2058_v23 = vpop.f32.mrf.mxu1 }
 0x44a   :  { %v1088_v19 = vadd.f32 %v2057_v1, %v3153_v48 }
 0x44b   :  { %v2059_v29 = vpop.f32.mrf.mxu1 }
 0x44c   :  { %v2060_v36 = vadd.f32 %v2059_v29, %v2058_v23 }
 0x44d   :  { %v2061_v22 = vpop.f32.mrf.mxu1 }
 0x44e   :  { %v1093_v41 = vadd.f32 %v2060_v36, %v3153_v48 }
 0x44f   :  { %v2062_v30 = vpop.f32.mrf.mxu1 }
 0x450   :  { %v2063_v42 = vadd.f32 %v2062_v30, %v2061_v22 }
 0x451   :  { %v2064_v31 = vpop.f32.mrf.mxu1 }
 0x452   :  { %v1098_v6 = vadd.f32 %v2063_v42, %v3153_v48 }
 0x453   :  { %v2065_v0 = vpop.f32.mrf.mxu1 }
 0x454   :  { %v2066_v17 = vadd.f32 %v2065_v0, %v2064_v31 }
 0x455   :  { %v2067_v32 = vpop.f32.mrf.mxu1 }
 0x456   :  { %v1103_v59 = vadd.f32 %v2066_v17, %v3153_v48 }
 0x457   :  { %v2068_v3 = vpop.f32.mrf.mxu1 }
 0x458   :  { %v2069_v63 = vadd.f32 %v2068_v3, %v2067_v32 }
 0x459   :  { %v2070_v5 = vpop.f32.mrf.mxu1 }
 0x45a   :  { %v1108_v30 = vadd.f32 %v2069_v63, %v3153_v48  ;;  %v2626_v63 = vld [vmem:[#allocation6 + $0x28] sm:$0xff] }
 0x45b   :  { %v2071_v8 = vpop.f32.mrf.mxu1 }
 0x45c   :  { %v2072_v56 = vadd.f32 %v2071_v8, %v2070_v5 }
 0x45d   :  { %v3146_v9 = vpop.f32.mrf.mxu1 }
 0x45e   :  { %v1113_v23 = vadd.f32 %v2072_v56, %v3153_v48  ;;  %v2623_v56 = vld [vmem:[#allocation6 + $0x10] sm:$0xff] }
 0x45f   :  { %v3148_v43 = vpop.f32.mrf.mxu1 }
 0x460   :  { %v2075_v22 = vadd.f32 %v3148_v43, %v3146_v9 }
 0x461   :  { %v2076_v49 = vpop.f32.mrf.mxu1 }
 0x462   :  { %v1118_v61 = vadd.f32 %v2075_v22, %v3153_v48  ;;  %v1610_v22 = vlaneseq }
 0x463   :  { %v2077_v15 = vpop.f32.mrf.mxu1 }
 0x464   :  { %v2078_v28 = vadd.f32 %v2077_v15, %v2076_v49 }
 0x465   :  { %v2079_v58 = vpop.f32.mrf.mxu1 }
 0x466   :  { %v1123_v44 = vadd.f32 %v2078_v28, %v3153_v48  ;;  %v2634_v28 = vld [vmem:[#allocation6 + $0x68] sm:$0xff] }
 0x467   :  { %v2080_v40 = vpop.f32.mrf.mxu1 }
 0x468   :  { %v2081_v49 = vadd.f32 %v2080_v40, %v2079_v58 }
 0x469   :  { %v2082_v54 = vpop.f32.mrf.mxu1 }
 0x46b   :  { %v2083_v24 = vpop.f32.mrf.mxu1 }
 0x46c   :  { %v2084_v3 = vadd.f32 %v2083_v24, %v2082_v54  ;;  %v2622_v54 = vld [vmem:[#allocation6 + $0x8] sm:$0xff]  ;;  %v2633_v24 = vld [vmem:[#allocation6 + $0x60] sm:$0xff] }
 0x4d3   :  { %v2383_v12 = vpop.f32.mrf.mxu0 }
 0x4d4   :  { %v1208_v7 = vadd.f32 %v2383_v12, %v1063_v55  ;;  %v1133_v12 = vadd.f32 %v2084_v3, %v3153_v48 }
 0x4d5   :  { %v1202_v14 = vpop.f32.mrf.mxu0 }
 0x4d6   :  { %v1203_v45 = vadd.f32 %v1202_v14, %v1058_v13  ;;  %v1128_v14 = vadd.f32 %v2081_v49, %v3153_v48 }
 0x4d7   :  { %v2386_v51 = vpop.f32.mrf.mxu0 }
 0x4d8   :  { %2526 = vtanh.f32 %v1203_v45  ;;  %v1218_v34 = vadd.f32 %v2386_v51, %v1073_v16 }
 0x4d9   :  { %2528 = vtanh.f32 %v1208_v7  ;;  %v1212_v57 = vpop.f32.mrf.mxu0 }
 0x4da   :  { %v1213_v35 = vadd.f32 %v1212_v57, %v1068_v53 }
 0x4db   :  { %v2389_v37 = vpop.f32.mrf.mxu0 }
 0x4dc   :  { %2530 = vtanh.f32 %v1213_v35  ;;  %v1228_v50 = vadd.f32 %v2389_v37, %v1083_v62 }
 0x4dd   :  { %2532 = vtanh.f32 %v1218_v34  ;;  %v1222_v39 = vpop.f32.mrf.mxu0 }
 0x4de   :  { %v1223_v4 = vadd.f32 %v1222_v39, %v1078_v38 }
 0x4df   :  { %v2392_v18 = vpop.f32.mrf.mxu0 }
 0x4e0   :  { %2534 = vtanh.f32 %v1223_v4  ;;  %v1238_v52 = vadd.f32 %v2392_v18, %v1093_v41 }
 0x4e1   :  { %2536 = vtanh.f32 %v1228_v50  ;;  %v1232_v20 = vpop.f32.mrf.mxu0 }
 0x4e2   :  { %v1233_v21 = vadd.f32 %v1232_v20, %v1088_v19 }
 0x4e3   :  { %v2395_v60 = vpop.f32.mrf.mxu0 }
 0x4e4   :  { %2538 = vtanh.f32 %v1233_v21  ;;  %v1248_v11 = vadd.f32 %v2395_v60, %v1103_v59  ;;  %v2624_v59 = vld [vmem:[#allocation6 + $0x18] sm:$0xff]  ;;  %v2625_v60 = vld [vmem:[#allocation6 + $0x20] sm:$0xff] }
 0x4e5   :  { %v2527_v10 = vpop.eup %2526  ;;  %2540 = vtanh.f32 %v1238_v52  ;;  %v1242_v27 = vpop.f32.mrf.mxu0 }
 0x4e6   :  { %v2529_v25 = vpop.eup %2528  ;;  %v1243_v26 = vadd.f32 %v1242_v27, %v1098_v6  ;;  %2437 = vmatprep.mubr.f32.mxu0 %v2527_v10  ;;  %v2627_v6 = vld [vmem:[#allocation6 + $0x30] sm:$0xff]  ;;  %v2628_v10 = vld [vmem:[#allocation6 + $0x38] sm:$0xff]  ;;  %v2630_v27 = vld [vmem:[#allocation6 + $0x48] sm:$0xff] }
 0x4e7   :  { %v2398_v29 = vpop.f32.mrf.mxu0  ;;  %2438 = vmatmul.mubr.f32.vlgmr.msra.gmra.mxu0 %v2529_v25  ;;  %v2631_v25 = vld [vmem:[#allocation6 + $0x50] sm:$0xff] }
 0x4e8   :  { %2542 = vtanh.f32 %v1243_v26  ;;  %v1258_v0 = vadd.f32 %v2398_v29, %v1113_v23  ;;  %v2632_v26 = vld [vmem:[#allocation6 + $0x58] sm:$0xff]  ;;  %v2635_v23 = vld [vmem:[#allocation6 + $0x70] sm:$0xff] }
 0x4e9   :  { %v2531_v31 = vpop.eup %2530  ;;  %2544 = vtanh.f32 %v1248_v11  ;;  %v1252_v32 = vpop.f32.mrf.mxu0  ;;  %v2629_v11 = vld [vmem:[#allocation6 + $0x40] sm:$0xff]  ;;  %v2636_v29 = vld [vmem:[#allocation6 + $0x78] sm:$0xff] }
 0x4ea   :  { %v2533_v5 = vpop.eup %2532  ;;  %v1253_v8 = vadd.f32 %v1252_v32, %v1108_v30  ;;  %2440 = vmatprep.mubr.f32.mxu0 %v2531_v31  ;;  %v3173_v30 = vand.u32 127, %v1610_v22  ;;  %v1828_v31 = vld [vmem:[%s3306_s9] ss:$0 sm:$0xff]  ;;  %s2795_s9 = smov [#allocation14]  }
 0x4eb   :  { %v2401_v47 = vpop.f32.mrf.mxu0  ;;  %2441 = vmatmul.mubr.f32.gmra.mxu0 %v2533_v5  ;;  %s1810_s26 = sshll.u32 %s2795_s9, 4  ;;  %s1811_s26 = int_to_ptr.vmem [resolvable:$true] %s1810_s26 }
 0x4ec   :  { %2546 = vtanh.f32 %v1253_v8  ;;  %v1268_v43 = vadd.f32 %v2401_v47, %v1123_v44  ;;  %vm1612_vm0 = vcmp.lt.s32.totalorder %v3173_v30, 8  ;;  %s2757_s27 = scalar_lea.vmem %s1811_s26, 2048  ;;  %p2762_p3 = scmp.lt.s32.totalorder %s1811_s26, %s1811_s26 }
 0x4ed   :  { %v2535_v9 = vpop.eup %2534  ;;  %2548 = vtanh.f32 %v1258_v0  ;;  %v1262_v55 = vpop.f32.mrf.mxu0  ;;  %p2758_p2 = scmp.ne.s32.totalorder %s1811_s26, %s2757_s27  ;;  %p2763_p4 = scmp.lt.s32.totalorder %s2757_s27, %s2757_s27 }
 0x4ee   :  { %v2537_v2 = vpop.eup %2536  ;;  %v1263_v13 = vadd.f32 %v1262_v55, %v1118_v61  ;;  %2443 = vmatprep.mubr.f32.mxu0 %v2535_v9 }
 0x4ef   :  { %v2404_v7 = vpop.f32.mrf.mxu0  ;;  %2444 = vmatmul.mubr.f32.gmra.mxu0 %v2537_v2  ;;  %p2764_p5 = por %p2763_p4, %p2762_p3 }
 0x4f0   :  { %2550 = vtanh.f32 %v1263_v13  ;;  %v1278_v15 = vadd.f32 %v2404_v7, %v1133_v12 }
 0x4f1   :  { %v2539_v45 = vpop.eup %2538  ;;  %2552 = vtanh.f32 %v1268_v43  ;;  %v1272_v46 = vpop.f32.mrf.mxu0  ;;  %p2765_p6 = pnand %p2764_p5, %p2758_p2 }
 0x4f2   :  { %v2541_v16 = vpop.eup %2540  ;;  %v1273_v51 = vadd.f32 %v1272_v46, %v1128_v14  ;;  %2446 = vmatprep.mubr.f32.mxu0 %v2539_v45 }
 0x4f3   :  { %2447 = vmatmul.mubr.f32.gmra.mxu0 %v2541_v16 }
 0x4f4   :  { %2554 = vtanh.f32 %v1273_v51 }
 0x4f5   :  { %v2543_v33 = vpop.eup %2542  ;;  %2556 = vtanh.f32 %v1278_v15 }
 0x4f6   :  { %v2545_v53 = vpop.eup %2544  ;;  %2449 = vmatprep.mubr.f32.mxu0 %v2543_v33 }
 0x4f7   :  { %2450 = vmatmul.mubr.f32.gmra.mxu0 %v2545_v53 }
 0x4f9   :  { %v2547_v34 = vpop.eup %2546 }
 0x4fa   :  { %v2549_v57 = vpop.eup %2548  ;;  %2452 = vmatprep.mubr.f32.mxu0 %v2547_v34 }
 0x4fb   :  { %2453 = vmatmul.mubr.f32.gmra.mxu0 %v2549_v57 }
 0x4fd   :  { %v2551_v35 = vpop.eup %2550 }
 0x4fe   :  { %v2553_v48 = vpop.eup %2552  ;;  %2455 = vmatprep.mubr.f32.mxu0 %v2551_v35 }
 0x4ff   :  { %2456 = vmatmul.mubr.f32.gmra.mxu0 %v2553_v48 }
 0x501   :  { %v2555_v58 = vpop.eup %2554 }
 0x502   :  { %v2557_v36 = vpop.eup %2556  ;;  %2458 = vmatprep.mubr.f32.mxu0 %v2555_v58 }
 0x503   :  { %2459 = vmatmul.mubr.f32.gmra.mxu0 %v2557_v36 }
 0x5a7   :  { %v2439_v62 = vpop.f32.mrf.mxu0 }
 0x5a9   :  { %v1379_v37 = vpop.f32.mrf.mxu0 }
 0x5ab   :  { %v2442_v1 = vpop.f32.mrf.mxu0 }
 0x5ad   :  { %v1389_v38 = vpop.f32.mrf.mxu0 }
 0x5af   :  { %v2445_v50 = vpop.f32.mrf.mxu0 }
 0x5b1   :  { %v1399_v39 = vpop.f32.mrf.mxu0 }
 0x5b3   :  { %v2448_v4 = vpop.f32.mrf.mxu0 }
 0x5b5   :  { %v1409_v40 = vpop.f32.mrf.mxu0 }
 0x5b7   :  { %v2451_v17 = vpop.f32.mrf.mxu0 }
 0x5b9   :  { %v1419_v41 = vpop.f32.mrf.mxu0 }
 0x5bb   :  { %v2454_v18 = vpop.f32.mrf.mxu0 }
 0x5bd   :  { %v1429_v42 = vpop.f32.mrf.mxu0 }
 0x5bf   :  { %v2457_v19 = vpop.f32.mrf.mxu0 }
 0x5c1   :  { %v1439_v52 = vpop.f32.mrf.mxu0 }
 0x5c3   :  { %v2460_v20 = vpop.f32.mrf.mxu0 }
 0x5c4   :  { %2461 = vmatprep.subr.mxu1 %v2460_v20 }
 0x5c5   :  { %v1449_v21 = vpop.f32.mrf.mxu0  ;;  %2462 = vmatpush3.msra.mxu1 %v2460_v20 }
 0x5c6   :  { %2463 = vmatprep.subr.mxu1 %v1449_v21 }
 0x5c7   :  { %2464 = vmatpush3.msra.mxu1 %v1449_v21 }
 0x5c8   :  { %2465 = vmatprep.subr.mxu1 %v2457_v19 }
 0x5c9   :  { %2466 = vmatpush3.msra.mxu1 %v2457_v19 }
 0x5ca   :  { %2467 = vmatprep.subr.mxu1 %v1439_v52 }
 0x5cb   :  { %2468 = vmatpush3.msra.mxu1 %v1439_v52 }
 0x5cc   :  { %2469 = vmatprep.subr.mxu1 %v2454_v18 }
 0x5cd   :  { %2470 = vmatpush3.msra.mxu1 %v2454_v18 }
 0x5ce   :  { %2471 = vmatprep.subr.mxu1 %v1429_v42 }
 0x5cf   :  { %2472 = vmatpush3.msra.mxu1 %v1429_v42 }
 0x5d0   :  { %2473 = vmatprep.subr.mxu1 %v2451_v17 }
 0x5d1   :  { %2474 = vmatpush3.msra.mxu1 %v2451_v17 }
 0x5d2   :  { %2475 = vmatprep.subr.mxu1 %v1419_v41 }
 0x5d3   :  { %2476 = vmatpush3.msra.mxu1 %v1419_v41 }
 0x5d4   :  { %2477 = vmatprep.subr.mxu1 %v2448_v4 }
 0x5d5   :  { %2478 = vmatpush3.msra.mxu1 %v2448_v4 }
 0x5d6   :  { %2479 = vmatprep.subr.mxu1 %v1409_v40 }
 0x5d7   :  { %2480 = vmatpush3.msra.mxu1 %v1409_v40 }
 0x5d8   :  { %2481 = vmatprep.subr.mxu1 %v2445_v50 }
 0x5d9   :  { %2482 = vmatpush3.msra.mxu1 %v2445_v50 }
 0x5da   :  { %2483 = vmatprep.subr.mxu1 %v1399_v39 }
 0x5db   :  { %2484 = vmatpush3.msra.mxu1 %v1399_v39 }
 0x5dc   :  { %2485 = vmatprep.subr.mxu1 %v2442_v1 }
 0x5dd   :  { %2486 = vmatpush3.msra.mxu1 %v2442_v1 }
 0x5de   :  { %2487 = vmatprep.subr.mxu1 %v1389_v38 }
 0x5df   :  { %2488 = vmatpush3.msra.mxu1 %v1389_v38 }
 0x5e0   :  { %2489 = vmatprep.subr.mxu1 %v2439_v62 }
 0x5e1   :  { %2490 = vmatpush3.msra.mxu1 %v2439_v62 }
 0x5e2   :  { %2491 = vmatprep.subr.mxu1 %v1379_v37 }
 0x5e3   :  { %2492 = vmatpush3.msra.mxu1 %v1379_v37 }
 0x5e4   :  { %2494 = vmatmul.mubr.f32.vlgmr.msra.gmra.mxu1 %v2622_v54 }
 0x5e5   :  { %2496 = vmatprep.mubr.f32.mxu1 %v2623_v56 }
 0x5e8   :  { %2497 = vmatmul.mubr.f32.gmra.mxu1 %v2624_v59 }
 0x5e9   :  { %2499 = vmatprep.mubr.f32.mxu1 %v2625_v60 }
 0x5ec   :  { %2500 = vmatmul.mubr.f32.gmra.mxu1 %v2626_v63 }
 0x5ed   :  { %2502 = vmatprep.mubr.f32.mxu1 %v2627_v6 }
 0x5f0   :  { %2503 = vmatmul.mubr.f32.gmra.mxu1 %v2628_v10 }
 0x5f1   :  { %2505 = vmatprep.mubr.f32.mxu1 %v2629_v11 }
 0x5f4   :  { %2506 = vmatmul.mubr.f32.gmra.mxu1 %v2630_v27 }
 0x5f5   :  { %2508 = vmatprep.mubr.f32.mxu1 %v2631_v25 }
 0x5f8   :  { %2509 = vmatmul.mubr.f32.gmra.mxu1 %v2632_v26 }
 0x5f9   :  { %2511 = vmatprep.mubr.f32.mxu1 %v2633_v24 }
 0x5fc   :  { %2512 = vmatmul.mubr.f32.gmra.mxu1 %v2634_v28 }
 0x5fd   :  { %2514 = vmatprep.mubr.f32.mxu1 %v2635_v23 }
 0x600   :  { %2515 = vmatmul.mubr.f32.gmra.mxu1 %v2636_v29 }
 0x6a4   :  { %v2495_v0 = vpop.f32.mrf.mxu1 }
 0x6a5   :  { %v1537_v32 = vadd.f32 %v2495_v0, %v1828_v31 }
 0x6a6   :  { %v1531_v3 = vpop.f32.mrf.mxu1 }
 0x6a7   :  { %v1532_v5 = vadd.f32 %v1828_v31, %v1531_v3  ;;  %v1614_v8 = vsel %vm1612_vm0, %v1537_v32, -1e+30 }
 0x6a8   :  { %1631 = vmax.xlane.f32.xlu0 %v1614_v8  ;;  %v2498_v44 = vpop.f32.mrf.mxu1 }
 0x6a9   :  { %v1547_v47 = vadd.f32 %v2498_v44, %v1828_v31  ;;  %v1613_v43 = vsel %vm1612_vm0, %v1532_v5, -1e+30 }
 0x6aa   :  { %v1541_v49 = vpop.f32.mrf.mxu1 }
 0x6ab   :  { %v1542_v61 = vadd.f32 %v1828_v31, %v1541_v49  ;;  %v1616_v9 = vsel %vm1612_vm0, %v1547_v47, -1e+30 }
 0x6ac   :  { %1635 = vmax.xlane.f32.xlu1 %v1616_v9  ;;  %v2501_v55 = vpop.f32.mrf.mxu1  ;;  %1629 = vmax.xlane.f32.xlu0 %v1613_v43 }
 0x6ad   :  { %v1557_v2 = vadd.f32 %v2501_v55, %v1828_v31  ;;  %v1615_v7 = vsel %vm1612_vm0, %v1542_v61, -1e+30 }
 0x6ae   :  { %v1551_v12 = vpop.f32.mrf.mxu1 }
 0x6af   :  { %v1552_v13 = vadd.f32 %v1828_v31, %v1551_v12  ;;  %v1618_v51 = vsel %vm1612_vm0, %v1557_v2, -1e+30 }
 0x6b0   :  { %v2504_v14 = vpop.f32.mrf.mxu1  ;;  %1633 = vmax.xlane.f32.xlu1 %v1615_v7 }
 0x6b1   :  { %v1617_v45 = vsel %vm1612_vm0, %v1552_v13, -1e+30  ;;  %v1567_v46 = vadd.f32 %v2504_v14, %v1828_v31 }
 0x6b2   :  { %v1561_v15 = vpop.f32.mrf.mxu1  ;;  %1637 = vmax.xlane.f32.xlu0 %v1617_v45 }
 0x6b3   :  { %v1562_v16 = vadd.f32 %v1828_v31, %v1561_v15  ;;  %v1620_v48 = vsel %vm1612_vm0, %v1567_v46, -1e+30 }
 0x6b4   :  { %v2507_v33 = vpop.f32.mrf.mxu1  ;;  %1639 = vmax.xlane.f32.xlu1 %v1618_v51 }
 0x6b5   :  { %v1619_v53 = vsel %vm1612_vm0, %v1562_v16, -1e+30  ;;  %v1577_v57 = vadd.f32 %v2507_v33, %v1828_v31 }
 0x6b6   :  { %v1571_v34 = vpop.f32.mrf.mxu1  ;;  %1641 = vmax.xlane.f32.xlu0 %v1619_v53 }
 0x6b7   :  { %v1572_v35 = vadd.f32 %v1828_v31, %v1571_v34  ;;  %v1622_v38 = vsel %vm1612_vm0, %v1577_v57, -1e+30 }
 0x6b8   :  { %v2510_v58 = vpop.f32.mrf.mxu1  ;;  %1643 = vmax.xlane.f32.xlu1 %v1620_v48 }
 0x6b9   :  { %v1621_v36 = vsel %vm1612_vm0, %v1572_v35, -1e+30  ;;  %v1587_v37 = vadd.f32 %v2510_v58, %v1828_v31 }
 0x6ba   :  { %v1581_v62 = vpop.f32.mrf.mxu1  ;;  %1645 = vmax.xlane.f32.xlu0 %v1621_v36 }
 0x6bb   :  { %v1582_v1 = vadd.f32 %v1828_v31, %v1581_v62  ;;  %v1624_v41 = vsel %vm1612_vm0, %v1587_v37, -1e+30 }
 0x6bc   :  { %v2513_v50 = vpop.f32.mrf.mxu1  ;;  %1647 = vmax.xlane.f32.xlu1 %v1622_v38 }
 0x6bd   :  { %v1623_v39 = vsel %vm1612_vm0, %v1582_v1, -1e+30  ;;  %v1597_v40 = vadd.f32 %v2513_v50, %v1828_v31 }
 0x6be   :  { %v1591_v4 = vpop.f32.mrf.mxu1  ;;  %1649 = vmax.xlane.f32.xlu0 %v1623_v39 }
 0x6bf   :  { %v1592_v17 = vadd.f32 %v1828_v31, %v1591_v4  ;;  %v3210_v21 = vsel %vm1612_vm0, %v1597_v40, -1e+30 }
 0x6c0   :  { %v2516_v18 = vpop.f32.mrf.mxu1  ;;  %1651 = vmax.xlane.f32.xlu1 %v1624_v41 }
 0x6c1   :  { %v3205_v42 = vsel %vm1612_vm0, %v1592_v17, -1e+30  ;;  %v1607_v52 = vadd.f32 %v2516_v18, %v1828_v31 }
 0x6c2   :  { %v1601_v19 = vpop.f32.mrf.mxu1  ;;  %1653 = vmax.xlane.f32.xlu0 %v3205_v42 }
 0x6c3   :  { %v1602_v20 = vadd.f32 %v1828_v31, %v1601_v19  ;;  %v3220_v56 = vsel %vm1612_vm0, %v1607_v52, -1e+30 }
 0x6c4   :  { %1655 = vmax.xlane.f32.xlu1 %v3210_v21 }
 0x6c5   :  { %v3215_v54 = vsel %vm1612_vm0, %v1602_v20, -1e+30 }
 0x6c6   :  { %1657 = vmax.xlane.f32.xlu0 %v3215_v54 }
 0x6c8   :  { %1659 = vmax.xlane.f32.xlu1 %v3220_v56 }
 0x731   :  { %v1632_v59 = vpop.xlane.xlu0 %1631 }
 0x732   :  { %v3223_v60 = vsub.f32 %v1614_v8, %v1632_v59 }
 0x734   :  { %v1679_v63 = vmul.f32 1.442695, %v3223_v60 }
 0x735   :  { %v1636_v6 = vpop.xlane.xlu1 %1635  ;;  %v1630_v10 = vpop.xlane.xlu0 %1629 }
 0x736   :  { %2558 = vpow2.f32 %v1679_v63  ;;  %v3226_v11 = vsub.f32 %v1616_v9, %v1636_v6  ;;  %v3228_v27 = vsub.f32 %v1613_v43, %v1630_v10 }
 0x738   :  { %v1683_v25 = vmul.f32 1.442695, %v3226_v11  ;;  %v1677_v26 = vmul.f32 1.442695, %v3228_v27 }
 0x739   :  { %v1634_v24 = vpop.xlane.xlu1 %1633 }
 0x73a   :  { %2560 = vpow2.f32 %v1683_v25  ;;  %v3232_v28 = vsub.f32 %v1615_v7, %v1634_v24 }
 0x73b   :  { %2562 = vpow2.f32 %v1677_v26  ;;  %v1638_v23 = vpop.xlane.xlu0 %1637 }
 0x73c   :  { %v1681_v29 = vmul.f32 1.442695, %v3232_v28  ;;  %v3235_v22 = vsub.f32 %v1617_v45, %v1638_v23 }
 0x73d   :  { %v1640_v30 = vpop.xlane.xlu1 %1639 }
 0x73e   :  { %2564 = vpow2.f32 %v1681_v29  ;;  %v3237_v31 = vsub.f32 %v1618_v51, %v1640_v30  ;;  %v1685_v0 = vmul.f32 1.442695, %v3235_v22 }
 0x73f   :  { %v1642_v32 = vpop.xlane.xlu0 %1641 }
 0x740   :  { %v1687_v3 = vmul.f32 1.442695, %v3237_v31  ;;  %v3241_v5 = vsub.f32 %v1619_v53, %v1642_v32 }
 0x741   :  { %v1644_v8 = vpop.xlane.xlu1 %1643 }
 0x742   :  { %2566 = vpow2.f32 %v1687_v3  ;;  %v3243_v44 = vsub.f32 %v1620_v48, %v1644_v8  ;;  %v1689_v49 = vmul.f32 1.442695, %v3241_v5 }
 0x743   :  { %v2559_v47 = vpop.eup %2558  ;;  %2568 = vpow2.f32 %v1685_v0  ;;  %v1646_v61 = vpop.xlane.xlu0 %1645 }
 0x744   :  { %v1691_v9 = vmul.f32 1.442695, %v3243_v44  ;;  %v3247_v43 = vsub.f32 %v1621_v36, %v1646_v61  ;;  %1711 = vadd.xlane.f32.xlu1 %v2559_v47 }
 0x745   :  { %v1648_v55 = vpop.xlane.xlu1 %1647 }
 0x746   :  { %2570 = vpow2.f32 %v1691_v9  ;;  %v3249_v12 = vsub.f32 %v1622_v38, %v1648_v55  ;;  %v1693_v13 = vmul.f32 1.442695, %v3247_v43 }
 0x747   :  { %v2561_v2 = vpop.eup %2560  ;;  %2572 = vpow2.f32 %v1689_v49  ;;  %v1650_v7 = vpop.xlane.xlu0 %1649 }
 0x748   :  { %v2563_v14 = vpop.eup %2562  ;;  %v1695_v45 = vmul.f32 1.442695, %v3249_v12  ;;  %v3253_v15 = vsub.f32 %v1623_v39, %v1650_v7  ;;  %1715 = vadd.xlane.f32.xlu1 %v2561_v2 }
 0x749   :  { %1709 = vadd.xlane.f32.xlu0 %v2563_v14  ;;  %v1652_v46 = vpop.xlane.xlu1 %1651 }
 0x74a   :  { %2574 = vpow2.f32 %v1695_v45  ;;  %v3255_v16 = vsub.f32 %v1624_v41, %v1652_v46  ;;  %v1697_v33 = vmul.f32 1.442695, %v3253_v15 }
 0x74b   :  { %v2565_v51 = vpop.eup %2564  ;;  %2576 = vpow2.f32 %v1693_v13  ;;  %v1654_v53 = vpop.xlane.xlu0 %1653 }
 0x74c   :  { %v1699_v34 = vmul.f32 1.442695, %v3255_v16  ;;  %v3260_v57 = vsub.f32 %v3205_v42, %v1654_v53 }
 0x74d   :  { %1713 = vadd.xlane.f32.xlu0 %v2565_v51  ;;  %v1656_v35 = vpop.xlane.xlu1 %1655 }
 0x74e   :  { %2578 = vpow2.f32 %v1699_v34  ;;  %v3263_v48 = vsub.f32 %v3210_v21, %v1656_v35  ;;  %v1701_v36 = vmul.f32 1.442695, %v3260_v57 }
 0x74f   :  { %v2567_v58 = vpop.eup %2566  ;;  %2580 = vpow2.f32 %v1697_v33  ;;  %v1658_v62 = vpop.xlane.xlu0 %1657 }
 0x750   :  { %v2569_v37 = vpop.eup %2568  ;;  %v1703_v1 = vmul.f32 1.442695, %v3263_v48  ;;  %v3268_v38 = vsub.f32 %v3215_v54, %v1658_v62  ;;  %1719 = vadd.xlane.f32.xlu1 %v2567_v58 }
 0x751   :  { %1717 = vadd.xlane.f32.xlu0 %v2569_v37  ;;  %v1660_v50 = vpop.xlane.xlu1 %1659 }
 0x752   :  { %2582 = vpow2.f32 %v1703_v1  ;;  %v3271_v39 = vsub.f32 %v3220_v56, %v1660_v50  ;;  %v1705_v40 = vmul.f32 1.442695, %v3268_v38 }
 0x753   :  { %v2571_v4 = vpop.eup %2570  ;;  %2584 = vpow2.f32 %v1701_v36 }
 0x754   :  { %v2573_v17 = vpop.eup %2572  ;;  %v1707_v41 = vmul.f32 1.442695, %v3271_v39  ;;  %1723 = vadd.xlane.f32.xlu1 %v2571_v4 }
 0x755   :  { %1721 = vadd.xlane.f32.xlu0 %v2573_v17 }
 0x756   :  { %2586 = vpow2.f32 %v1707_v41 }
 0x757   :  { %v2575_v18 = vpop.eup %2574  ;;  %2588 = vpow2.f32 %v1705_v40 }
 0x758   :  { %v2577_v42 = vpop.eup %2576  ;;  %1727 = vadd.xlane.f32.xlu1 %v2575_v18 }
 0x759   :  { %1725 = vadd.xlane.f32.xlu0 %v2577_v42 }
 0x75b   :  { %v2579_v19 = vpop.eup %2578 }
 0x75c   :  { %v2581_v52 = vpop.eup %2580  ;;  %1731 = vadd.xlane.f32.xlu1 %v2579_v19 }
 0x75d   :  { %1729 = vadd.xlane.f32.xlu0 %v2581_v52 }
 0x75f   :  { %v2583_v20 = vpop.eup %2582 }
 0x760   :  { %v2585_v21 = vpop.eup %2584  ;;  %1735 = vadd.xlane.f32.xlu1 %v2583_v20 }
 0x761   :  { %1733 = vadd.xlane.f32.xlu0 %v2585_v21 }
 0x763   :  { %v2587_v54 = vpop.eup %2586 }
 0x764   :  { %v2589_v56 = vpop.eup %2588  ;;  %1739 = vadd.xlane.f32.xlu1 %v2587_v54 }
 0x765   :  { %1737 = vadd.xlane.f32.xlu0 %v2589_v56 }
 0x7cd   :  { %v1712_v59 = vpop.xlane.xlu1 %1711 }
 0x7ce   :  { %2590 = vlog2.f32 %v1712_v59 }
 0x7d1   :  { %v1716_v63 = vpop.xlane.xlu1 %1715 }
 0x7d2   :  { %2592 = vlog2.f32 %v1716_v63  ;;  %v1710_v6 = vpop.xlane.xlu0 %1709 }
 0x7d3   :  { %2594 = vlog2.f32 %v1710_v6 }
 0x7d6   :  { %v1714_v10 = vpop.xlane.xlu0 %1713 }
 0x7d7   :  { %2596 = vlog2.f32 %v1714_v10 }
 0x7d9   :  { %v1720_v25 = vpop.xlane.xlu1 %1719 }
 0x7da   :  { %2598 = vlog2.f32 %v1720_v25  ;;  %v1718_v26 = vpop.xlane.xlu0 %1717 }
 0x7db   :  { %v2591_v24 = vpop.eup %2590  ;;  %2600 = vlog2.f32 %v1718_v26 }
 0x7dc   :  { %v1744_v23 = vmul.f32 0.6931472, %v2591_v24 }
 0x7dd   :  { %v1724_v29 = vpop.xlane.xlu1 %1723 }
 0x7de   :  { %v1774_v30 = vsub.f32 %v3223_v60, %v1744_v23  ;;  %2602 = vlog2.f32 %v1724_v29  ;;  %v1722_v0 = vpop.xlane.xlu0 %1721 }
 0x7df   :  { %v2593_v32 = vpop.eup %2592  ;;  %2604 = vlog2.f32 %v1722_v0 }
 0x7e0   :  { %v2595_v3 = vpop.eup %2594  ;;  %1790 = vst [vmem:[#allocation14 + $0x8] sm:$0xff] %v1774_v30  ;;  %v1748_v8 = vmul.f32 0.6931472, %v2593_v32 }
 0x7e1   :  { %v1742_v47 = vmul.f32 0.6931472, %v2595_v3  ;;  %v1728_v49 = vpop.xlane.xlu1 %1727 }
 0x7e2   :  { %v1776_v61 = vsub.f32 %v3226_v11, %v1748_v8  ;;  %2606 = vlog2.f32 %v1728_v49  ;;  %v1726_v9 = vpop.xlane.xlu0 %1725 }
 0x7e3   :  { %v1773_v55 = vsub.f32 %v3228_v27, %v1742_v47  ;;  %2608 = vlog2.f32 %v1726_v9 }
 0x7e4   :  { %v2597_v2 = vpop.eup %2596  ;;  %1792 = vst [vmem:[#allocation14 + $0x18] sm:$0xff] %v1776_v61 }
 0x7e5   :  { %1789 = vst [vmem:[#allocation14] sm:$0xff] %v1773_v55  ;;  %v1746_v60 = vmul.f32 0.6931472, %v2597_v2  ;;  %v1732_v13 = vpop.xlane.xlu1 %1731 }
 0x7e6   :  { %2610 = vlog2.f32 %v1732_v13  ;;  %v1730_v7 = vpop.xlane.xlu0 %1729 }
 0x7e7   :  { %v2599_v14 = vpop.eup %2598  ;;  %v1775_v45 = vsub.f32 %v3232_v28, %v1746_v60  ;;  %2612 = vlog2.f32 %v1730_v7 }
 0x7e8   :  { %v2601_v46 = vpop.eup %2600  ;;  %v1752_v51 = vmul.f32 0.6931472, %v2599_v14 }
 0x7e9   :  { %1791 = vst [vmem:[#allocation14 + $0x10] sm:$0xff] %v1775_v45  ;;  %v1750_v11 = vmul.f32 0.6931472, %v2601_v46  ;;  %v1736_v33 = vpop.xlane.xlu1 %1735 }
 0x7ea   :  { %v1778_v53 = vsub.f32 %v3237_v31, %v1752_v51  ;;  %2614 = vlog2.f32 %v1736_v33  ;;  %v1734_v27 = vpop.xlane.xlu0 %1733 }
 0x7eb   :  { %v2603_v34 = vpop.eup %2602  ;;  %v1777_v35 = vsub.f32 %v3235_v22, %v1750_v11  ;;  %2616 = vlog2.f32 %v1734_v27 }
 0x7ec   :  { %v2605_v58 = vpop.eup %2604  ;;  %1794 = vst [vmem:[#allocation14 + $0x28] sm:$0xff] %v1778_v53  ;;  %v1756_v36 = vmul.f32 0.6931472, %v2603_v34 }
 0x7ed   :  { %1793 = vst [vmem:[#allocation14 + $0x20] sm:$0xff] %v1777_v35  ;;  %v1754_v62 = vmul.f32 0.6931472, %v2605_v58  ;;  %v1740_v28 = vpop.xlane.xlu1 %1739 }
 0x7ee   :  { %v1780_v37 = vsub.f32 %v3243_v44, %v1756_v36  ;;  %2618 = vlog2.f32 %v1740_v28  ;;  %v1738_v1 = vpop.xlane.xlu0 %1737 }
 0x7ef   :  { %v2607_v50 = vpop.eup %2606  ;;  %v1779_v4 = vsub.f32 %v3241_v5, %v1754_v62  ;;  %2620 = vlog2.f32 %v1738_v1 }
 0x7f0   :  { %v2609_v31 = vpop.eup %2608  ;;  %1796 = vst [vmem:[#allocation14 + $0x38] sm:$0xff] %v1780_v37  ;;  %v1760_v40 = vmul.f32 0.6931472, %v2607_v50 }
 0x7f1   :  { %1795 = vst [vmem:[#allocation14 + $0x30] sm:$0xff] %v1779_v4  ;;  %v1758_v22 = vmul.f32 0.6931472, %v2609_v31 }
 0x7f2   :  { %v1782_v17 = vsub.f32 %v3249_v12, %v1760_v40 }
 0x7f3   :  { %v2611_v41 = vpop.eup %2610  ;;  %v1781_v18 = vsub.f32 %v3247_v43, %v1758_v22 }
 0x7f4   :  { %v2613_v42 = vpop.eup %2612  ;;  %1798 = vst [vmem:[#allocation14 + $0x48] sm:$0xff] %v1782_v17  ;;  %v1764_v19 = vmul.f32 0.6931472, %v2611_v41 }
 0x7f5   :  { %1797 = vst [vmem:[#allocation14 + $0x40] sm:$0xff] %v1781_v18  ;;  %v1762_v44 = vmul.f32 0.6931472, %v2613_v42 }
 0x7f6   :  { %v1784_v52 = vsub.f32 %v3255_v16, %v1764_v19 }
 0x7f7   :  { %v2615_v20 = vpop.eup %2614  ;;  %v1783_v5 = vsub.f32 %v3253_v15, %v1762_v44 }
 0x7f8   :  { %v2617_v21 = vpop.eup %2616  ;;  %1800 = vst [vmem:[#allocation14 + $0x58] sm:$0xff] %v1784_v52  ;;  %v1768_v54 = vmul.f32 0.6931472, %v2615_v20 }
 0x7f9   :  { %1799 = vst [vmem:[#allocation14 + $0x50] sm:$0xff] %v1783_v5  ;;  %v1766_v56 = vmul.f32 0.6931472, %v2617_v21 }
 0x7fa   :  { %v1786_v12 = vsub.f32 %v3263_v48, %v1768_v54 }
 0x7fb   :  { %v2619_v59 = vpop.eup %2618  ;;  %v1785_v43 = vsub.f32 %v3260_v57, %v1766_v56 }
 0x7fc   :  { %v2621_v63 = vpop.eup %2620  ;;  %1802 = vst [vmem:[#allocation14 + $0x68] sm:$0xff] %v1786_v12  ;;  %v1772_v6 = vmul.f32 0.6931472, %v2619_v59 }
 0x7fd   :  { %1801 = vst [vmem:[#allocation14 + $0x60] sm:$0xff] %v1785_v43  ;;  %v1770_v16 = vmul.f32 0.6931472, %v2621_v63 }
 0x7fe   :  { %v1788_v10 = vsub.f32 %v3271_v39, %v1772_v6 }
 0x7ff   :  { %v1787_v15 = vsub.f32 %v3268_v38, %v1770_v16 }
 0x800   :  { %1804 = vst [vmem:[#allocation14 + $0x78] sm:$0xff] %v1788_v10 }
 0x801   :  { %1803 = vst [vmem:[#allocation14 + $0x70] sm:$0xff] %v1787_v15 }
 0x802   :  { %2768 = shalt.err (!%p2765_p6)
}
 0x803   :  { %1816 = dma.vmem_to_hbm [thread:$0]  %s1811_s26, 2048, %s3307_s10, [#allocation5], %s2789_s18, %s2789_s18, %s2790_s19  }
 0x804   :  { %2785 = dma.done.wait [#allocation5], 2048  }
 0x805   :  { %2786 = vsyncadd [#allocation5], 4294965248 }
 0x806   :  { %1820 = vsyncpa [#allocation4], 1 }
 0x807   :  { %1821 = vsyncpa [#allocation7], 1 }
 0x808   :  { %1822 = vsyncpa [#allocation10], 1 }
 0x809   :  { %1823 = vsyncpa [#allocation13], 1 }
 0x80a   :  { %1824 = vsyncpa [#allocation5], 1 }

</bundles_post_ra>
